<compile_context>
chip_gen: v7x
topology: tpu7x:2x2x1
jax: 0.10.0
libtpu: 0.0.40
codegen_flags: <defaults>
</compile_context>

<pallas_src>
import functools
import math

import jax
import jax.numpy as jnp
from jax import lax
from jax.experimental import pallas as pl
from jax.experimental.pallas import tpu as pltpu


# --------------------------------------------------------------------------
# Fused Pallas kernel: full DnCNN stack for one batch element
# --------------------------------------------------------------------------
def _dncnn_fused_kernel(x_ref, mask_ref, *refs,
                        layer_cfg, K, H, W, Wp, P, residual, ns):
    o_ref = refs[-1]
    wb_refs = refs[:-1]
    NV = H * Wp                    # lane-dense working width per layer
    row_shift = P * (Wp + 1)       # flat offset of core (0,0) inside padded slab
    depth = len(layer_cfg)

    x0 = x_ref[0]                  # (C0, NP) f32, zero-halo padded input
    mask = mask_ref[...]           # (1, NV) bf16: 1 on valid cols, 0 on wrap junk
    cur = x0.astype(jnp.bfloat16)  # bf16 activations between layers (matches ref)

    for i, (cin, cout, act, fused) in enumerate(layer_cfg):
        w = wb_refs[2 * i][...]             # fused: (cout, K*K*cin) bf16
        b = wb_refs[2 * i + 1][...]         # (cout, 1) f32

        if fused:
            # Implicit im2col in VMEM: stack the K*K shifted views along the
            # contracting axis, then a single MXU matmul for the whole layer.
            xcat = jnp.concatenate(
                [cur[:, kh * Wp + kw: kh * Wp + kw + NV]
                 for kh in range(K) for kw in range(K)], axis=0)
            acc = jnp.dot(w, xcat, preferred_element_type=jnp.float32)
        else:
            # Unaligned cin (e.g. 3-channel input layer): tap-wise accumulation.
            acc = jnp.zeros((cout, NV), jnp.float32)
            for kh in range(K):
                for kw in range(K):
                    off = kh * Wp + kw
                    acc = acc + jnp.dot(w[kh, kw], cur[:, off:off + NV],
                                        preferred_element_type=jnp.float32)

        acc = acc + b                                   # lane-broadcast bias
        if act == "relu":
            acc = jnp.maximum(acc, 0.0)
        elif act == "tanh":
            acc = jnp.tanh(acc)
        elif act == "leaky_relu":
            acc = jnp.where(acc >= 0, acc, 0.01 * acc)

        if i < depth - 1:
            # Re-establish exact per-layer SAME zero padding in the flat layout
            # (mask row-wrap garbage, then embed into a zero-halo slab), bf16.
            nxt = acc.astype(jnp.bfloat16) * mask
            zpad = jnp.zeros((cout, row_shift), jnp.bfloat16)
            cur = jnp.concatenate([zpad, nxt, zpad], axis=1)   # (cout, NP)
        else:
            if residual and ns > 0:
                # Residual: add first ns channels of the ORIGINAL f32 input
                # (already resident in VMEM), aligned to core positions.
                sc = x0[:ns, row_shift:row_shift + NV]
                if ns < cout:
                    sc = jnp.concatenate(
                        [sc, jnp.zeros((cout - ns, NV), jnp.float32)], axis=0)
                acc = acc + sc
            o_ref[0] = acc.astype(o_ref.dtype)


# --------------------------------------------------------------------------
# Wrapper: NCHW in / NCHW out (PyTorch convention)
# --------------------------------------------------------------------------
def dncnn_forward(x_nchw, params, *, residual, acts):
    B, C0, H, W = x_nchw.shape
    K = int(params[0][0].shape[-1])
    P = K // 2
    Hp, Wp = H + 2 * P, W + 2 * P
    NV = H * Wp                      # lane-dense working width
    NP = Hp * Wp + 2 * P             # flat padded length (+tail slack for taps)

    # Zero-pad spatially once, flatten to (C, Hp*Wp), append 2P slack lanes so
    # every tap slice [off, off+NV) stays in-bounds.  (No K*K im2col in HBM.)
    xp = jnp.pad(x_nchw, ((0, 0), (0, 0), (P, P), (P, P)))
    xp = xp.reshape(B, C0, Hp * Wp)
    xp = jnp.pad(xp, ((0, 0), (0, 0), (0, 2 * P)))

    # Column validity mask: flat position p is a real output column iff p%Wp < W.
    colmask = ((jnp.arange(NV) % Wp) < W).astype(jnp.bfloat16).reshape(1, NV)

    layer_cfg = []
    args = [xp, colmask]
    in_specs = [
        pl.BlockSpec((1, C0, NP), lambda b: (b, 0, 0)),
        pl.BlockSpec((1, NV), lambda b: (0, 0)),
    ]
    tanh_count = 0
    for i, (w, bb) in enumerate(params):
        cout, cin = int(w.shape[0]), int(w.shape[1])
        fused = (cin % 8 == 0) and (cin * K * K <= 256)
        layer_cfg.append((cin, cout, acts[i], fused))
        if acts[i] == "tanh":
            tanh_count += B * H * W * cout
        if fused:
            # (O,I,Kh,Kw) -> (O, Kh, Kw, I) -> (O, K*K*I): rows match the
            # tap-major / channel-minor concat order used inside the kernel.
            wt = (jnp.transpose(w, (0, 2, 3, 1))
                  .reshape(cout, K * K * cin).astype(jnp.bfloat16))
            in_specs.append(pl.BlockSpec((cout, K * K * cin),
                                         lambda b: (0, 0)))
        else:
            wt = jnp.transpose(w, (2, 3, 0, 1)).astype(jnp.bfloat16)  # (K,K,O,I)
            in_specs.append(pl.BlockSpec((K, K, cout, cin),
                                         lambda b: (0, 0, 0, 0)))
        bt = bb.reshape(cout, 1).astype(jnp.float32)
        args += [wt, bt]
        in_specs.append(pl.BlockSpec((cout, 1), lambda b: (0, 0)))

    cout_last = int(params[-1][0].shape[0])
    ns = min(C0, cout_last) if residual else 0

    flops = sum(2 * B * H * W * K * K * ci * co for ci, co, _, _ in layer_cfg)
    bytes_accessed = int(
        B * C0 * NP * 4 + NV * 2
        + sum(w.size * 2 + bb.size * 4 for w, bb in params)
        + B * cout_last * NV * 4)

    kernel = functools.partial(
        _dncnn_fused_kernel, layer_cfg=tuple(layer_cfg),
        K=K, H=H, W=W, Wp=Wp, P=P, residual=residual, ns=ns)

    out = pl.pallas_call(
        kernel,
        out_shape=jax.ShapeDtypeStruct((B, cout_last, NV), jnp.float32),
        grid=(B,),
        in_specs=in_specs,
        out_specs=pl.BlockSpec((1, cout_last, NV), lambda b: (b, 0, 0)),
        compiler_params=pltpu.CompilerParams(
            dimension_semantics=("parallel",)),
        cost_estimate=pl.CostEstimate(
            flops=flops, transcendentals=tanh_count,
            bytes_accessed=bytes_accessed),
    )(*args)

    # Un-flatten lane-dense output: (B,Cout,H*Wp) -> (B,Cout,H,Wp) -> strip halo.
    return out.reshape(B, cout_last, H, Wp)[:, :, :, :W]


# --------------------------------------------------------------------------
# Parameter construction (deterministic, mirrors DnCNN __init__ shapes, OIHW)
# --------------------------------------------------------------------------
def init_dncnn_params(key, nplanes_in, nplanes_out, nfeatures, kernel, depth,
                      bn=True):
    features = [nfeatures] * (depth - 1) + [nplanes_out]
    bns = [False] + [bn] * (depth - 2) + [False]
    params = []
    in_c = nplanes_in
    for i in range(depth):
        out_c = features[i]
        key, kw_, kb_, kg_ = jax.random.split(key, 4)
        std = math.sqrt(2.0 / (kernel * kernel * out_c))        # conv_init
        w = jax.random.normal(kw_, (out_c, in_c, kernel, kernel),
                              jnp.float32) * std                # OIHW
        if bns[i]:
            # conv has bias=False; fold eval-mode BatchNorm2d into the conv:
            # mean=0, var=1 (fresh running stats), beta=0 (batchnorm_init).
            gamma = jax.random.normal(kg_, (out_c,), jnp.float32) * std
            eps = 1e-5
            scale = gamma / jnp.sqrt(jnp.float32(1.0 + eps))
            w = w * scale[:, None, None, None]
            b = jnp.zeros((out_c,), jnp.float32)
        else:
            # torch Conv2d default bias init: U(-1/sqrt(fan_in), 1/sqrt(fan_in))
            bound = 1.0 / math.sqrt(in_c * kernel * kernel)
            b = jax.random.uniform(kb_, (out_c,), jnp.float32, -bound, bound)
        params.append((w, b))
        in_c = out_c
    return params


# --------------------------------------------------------------------------
# Pure-JAX reference (same bf16-operand / f32-accumulate numerics as kernel)
# --------------------------------------------------------------------------
def dncnn_reference(x_nchw, params, *, residual, acts):
    x = x_nchw
    nin = x.shape[1]
    for i, (w, b) in enumerate(params):
        pad = w.shape[-1] // 2
        lhs = x.astype(jnp.bfloat16).astype(jnp.float32)
        rhs = w.astype(jnp.bfloat16).astype(jnp.float32)
        y = lax.conv_general_dilated(
            lhs, rhs, (1, 1), [(pad, pad), (pad, pad)],
            dimension_numbers=("NCHW", "OIHW", "NCHW"),
            precision=lax.Precision.HIGHEST,
        ) + b[None, :, None, None]
        if acts[i] == "relu":
            y = jnp.maximum(y, 0.0)
        elif acts[i] == "tanh":
            y = jnp.tanh(y)
        elif acts[i] == "leaky_relu":
            y = jnp.where(y >= 0, y, 0.01 * y)
        x = y
    if residual:
        ns = min(nin, x.shape[1])
        x = x.at[:, :ns].add(x_nchw[:, :ns])
    return x


if __name__ == "__main__":
    # DnCNN(nplanes_in=3, nplanes_out=1, nfeatures=16, kernel=3, depth=3,
    #       activation=RELU, residual=True, bn=True, lastact=None)
    B, Cin, Hs, Ws = 2, 3, 16, 16
    nplanes_out, nfeatures, ksize, depth = 1, 16, 3, 3

    key = jax.random.PRNGKey(0)
    kx, kp = jax.random.split(key)
    x = jax.random.normal(kx, (B, Cin, Hs, Ws), jnp.float32)
    params = init_dncnn_params(kp, Cin, nplanes_out, nfeatures, ksize, depth,
                               bn=True)
    acts = ["relu"] * (depth - 1) + [None]       # lastact=None (linear)

    y = dncnn_forward(x, params, residual=True, acts=acts)
    y = jax.block_until_ready(y)

    y_ref = dncnn_reference(x, params, residual=True, acts=acts)
    assert y.shape == (B, nplanes_out, Hs, Ws)
    err = float(jnp.max(jnp.abs(y - y_ref)))
    assert err < 2e-2, err
    print("KERNEL_OK")
</pallas_src>

<mosaic_0001>
module attributes {stable_mosaic.version = 11 : i64} {
  func.func @_dncnn_fused_kernel(%arg0: i32, %arg1: memref<1x3x326xf32, #tpu.memory_space<vmem>>, %arg2: memref<1x288xbf16, #tpu.memory_space<vmem>>, %arg3: memref<3x3x16x3xbf16, #tpu.memory_space<vmem>>, %arg4: memref<16x1xf32, #tpu.memory_space<vmem>>, %arg5: memref<16x144xbf16, #tpu.memory_space<vmem>>, %arg6: memref<16x1xf32, #tpu.memory_space<vmem>>, %arg7: memref<1x144xbf16, #tpu.memory_space<vmem>>, %arg8: memref<1x1xf32, #tpu.memory_space<vmem>>, %arg9: memref<1x1x288xf32, #tpu.memory_space<vmem>>) attributes {dimension_semantics = [#tpu.dimension_semantics<parallel>], iteration_bounds = array<i64: 2>, scalar_prefetch = 0 : i64, scratch_operands = 0 : i64, tpu.core_type = #tpu.core_type<tc>, window_params = [{transform_indices = @transform_0, window_bounds = array<i64: 1, 3, 326>}, {pipeline_mode = #tpu.pipeline_mode<synchronous>, transform_indices = @transform_1, window_bounds = array<i64: 1, 288>}, {pipeline_mode = #tpu.pipeline_mode<synchronous>, transform_indices = @transform_2, window_bounds = array<i64: 3, 3, 16, 3>}, {pipeline_mode = #tpu.pipeline_mode<synchronous>, transform_indices = @transform_3, window_bounds = array<i64: 16, 1>}, {pipeline_mode = #tpu.pipeline_mode<synchronous>, transform_indices = @transform_4, window_bounds = array<i64: 16, 144>}, {pipeline_mode = #tpu.pipeline_mode<synchronous>, transform_indices = @transform_5, window_bounds = array<i64: 16, 1>}, {pipeline_mode = #tpu.pipeline_mode<synchronous>, transform_indices = @transform_6, window_bounds = array<i64: 1, 144>}, {pipeline_mode = #tpu.pipeline_mode<synchronous>, transform_indices = @transform_7, window_bounds = array<i64: 1, 1>}, {transform_indices = @transform_8, window_bounds = array<i64: 1, 1, 288>}]} {
    %c0 = arith.constant 0 : index
    %c0_0 = arith.constant 0 : index
    %c0_1 = arith.constant 0 : index
    %0 = vector.load %arg1[%c0, %c0_0, %c0_1] : memref<1x3x326xf32, #tpu.memory_space<vmem>>, vector<1x3x326xf32>
    %1 = vector.shape_cast %0 : vector<1x3x326xf32> to vector<3x326xf32>
    %c0_2 = arith.constant 0 : index
    %c0_3 = arith.constant 0 : index
    %2 = vector.load %arg2[%c0_2, %c0_3] : memref<1x288xbf16, #tpu.memory_space<vmem>>, vector<1x288xbf16>
    %3 = arith.truncf %1 : vector<3x326xf32> to vector<3x326xbf16>
    %c0_4 = arith.constant 0 : index
    %c0_5 = arith.constant 0 : index
    %c0_6 = arith.constant 0 : index
    %c0_7 = arith.constant 0 : index
    %4 = vector.load %arg3[%c0_4, %c0_5, %c0_6, %c0_7] : memref<3x3x16x3xbf16, #tpu.memory_space<vmem>>, vector<3x3x16x3xbf16>
    %c0_8 = arith.constant 0 : index
    %c0_9 = arith.constant 0 : index
    %5 = vector.load %arg4[%c0_8, %c0_9] : memref<16x1xf32, #tpu.memory_space<vmem>>, vector<16x1xf32>
    %cst = arith.constant 0.000000e+00 : f32
    %6 = vector.broadcast %cst : f32 to vector<16x288xf32>
    %7 = vector.extract_strided_slice %4 {offsets = [0, 0, 0, 0], sizes = [1, 1, 16, 3], strides = [1, 1, 1, 1]} : vector<3x3x16x3xbf16> to vector<1x1x16x3xbf16>
    %8 = vector.shape_cast %7 : vector<1x1x16x3xbf16> to vector<16x3xbf16>
    %9 = vector.extract_strided_slice %3 {offsets = [0, 0], sizes = [3, 288], strides = [1, 1]} : vector<3x326xbf16> to vector<3x288xbf16>
    %cst_10 = arith.constant dense<0.000000e+00> : vector<16x288xf32>
    %10 = tpu.matmul %8, %9, %cst_10 {dimension_numbers = #tpu.dot_dimension_numbers<[1], [0], [0], [1], [0, 0, 1, 1], [], []>} : vector<16x3xbf16>, vector<3x288xbf16>, vector<16x288xf32> -> vector<16x288xf32>
    %11 = arith.addf %6, %10 : vector<16x288xf32>
    %12 = vector.extract_strided_slice %4 {offsets = [0, 1, 0, 0], sizes = [1, 1, 16, 3], strides = [1, 1, 1, 1]} : vector<3x3x16x3xbf16> to vector<1x1x16x3xbf16>
    %13 = vector.shape_cast %12 : vector<1x1x16x3xbf16> to vector<16x3xbf16>
    %14 = vector.extract_strided_slice %3 {offsets = [0, 1], sizes = [3, 288], strides = [1, 1]} : vector<3x326xbf16> to vector<3x288xbf16>
    %cst_11 = arith.constant dense<0.000000e+00> : vector<16x288xf32>
    %15 = tpu.matmul %13, %14, %cst_11 {dimension_numbers = #tpu.dot_dimension_numbers<[1], [0], [0], [1], [0, 0, 1, 1], [], []>} : vector<16x3xbf16>, vector<3x288xbf16>, vector<16x288xf32> -> vector<16x288xf32>
    %16 = arith.addf %11, %15 : vector<16x288xf32>
    %17 = vector.extract_strided_slice %4 {offsets = [0, 2, 0, 0], sizes = [1, 1, 16, 3], strides = [1, 1, 1, 1]} : vector<3x3x16x3xbf16> to vector<1x1x16x3xbf16>
    %18 = vector.shape_cast %17 : vector<1x1x16x3xbf16> to vector<16x3xbf16>
    %19 = vector.extract_strided_slice %3 {offsets = [0, 2], sizes = [3, 288], strides = [1, 1]} : vector<3x326xbf16> to vector<3x288xbf16>
    %cst_12 = arith.constant dense<0.000000e+00> : vector<16x288xf32>
    %20 = tpu.matmul %18, %19, %cst_12 {dimension_numbers = #tpu.dot_dimension_numbers<[1], [0], [0], [1], [0, 0, 1, 1], [], []>} : vector<16x3xbf16>, vector<3x288xbf16>, vector<16x288xf32> -> vector<16x288xf32>
    %21 = arith.addf %16, %20 : vector<16x288xf32>
    %22 = vector.extract_strided_slice %4 {offsets = [1, 0, 0, 0], sizes = [1, 1, 16, 3], strides = [1, 1, 1, 1]} : vector<3x3x16x3xbf16> to vector<1x1x16x3xbf16>
    %23 = vector.shape_cast %22 : vector<1x1x16x3xbf16> to vector<16x3xbf16>
    %24 = vector.extract_strided_slice %3 {offsets = [0, 18], sizes = [3, 288], strides = [1, 1]} : vector<3x326xbf16> to vector<3x288xbf16>
    %cst_13 = arith.constant dense<0.000000e+00> : vector<16x288xf32>
    %25 = tpu.matmul %23, %24, %cst_13 {dimension_numbers = #tpu.dot_dimension_numbers<[1], [0], [0], [1], [0, 0, 1, 1], [], []>} : vector<16x3xbf16>, vector<3x288xbf16>, vector<16x288xf32> -> vector<16x288xf32>
    %26 = arith.addf %21, %25 : vector<16x288xf32>
    %27 = vector.extract_strided_slice %4 {offsets = [1, 1, 0, 0], sizes = [1, 1, 16, 3], strides = [1, 1, 1, 1]} : vector<3x3x16x3xbf16> to vector<1x1x16x3xbf16>
    %28 = vector.shape_cast %27 : vector<1x1x16x3xbf16> to vector<16x3xbf16>
    %29 = vector.extract_strided_slice %3 {offsets = [0, 19], sizes = [3, 288], strides = [1, 1]} : vector<3x326xbf16> to vector<3x288xbf16>
    %cst_14 = arith.constant dense<0.000000e+00> : vector<16x288xf32>
    %30 = tpu.matmul %28, %29, %cst_14 {dimension_numbers = #tpu.dot_dimension_numbers<[1], [0], [0], [1], [0, 0, 1, 1], [], []>} : vector<16x3xbf16>, vector<3x288xbf16>, vector<16x288xf32> -> vector<16x288xf32>
    %31 = arith.addf %26, %30 : vector<16x288xf32>
    %32 = vector.extract_strided_slice %4 {offsets = [1, 2, 0, 0], sizes = [1, 1, 16, 3], strides = [1, 1, 1, 1]} : vector<3x3x16x3xbf16> to vector<1x1x16x3xbf16>
    %33 = vector.shape_cast %32 : vector<1x1x16x3xbf16> to vector<16x3xbf16>
    %34 = vector.extract_strided_slice %3 {offsets = [0, 20], sizes = [3, 288], strides = [1, 1]} : vector<3x326xbf16> to vector<3x288xbf16>
    %cst_15 = arith.constant dense<0.000000e+00> : vector<16x288xf32>
    %35 = tpu.matmul %33, %34, %cst_15 {dimension_numbers = #tpu.dot_dimension_numbers<[1], [0], [0], [1], [0, 0, 1, 1], [], []>} : vector<16x3xbf16>, vector<3x288xbf16>, vector<16x288xf32> -> vector<16x288xf32>
    %36 = arith.addf %31, %35 : vector<16x288xf32>
    %37 = vector.extract_strided_slice %4 {offsets = [2, 0, 0, 0], sizes = [1, 1, 16, 3], strides = [1, 1, 1, 1]} : vector<3x3x16x3xbf16> to vector<1x1x16x3xbf16>
    %38 = vector.shape_cast %37 : vector<1x1x16x3xbf16> to vector<16x3xbf16>
    %39 = vector.extract_strided_slice %3 {offsets = [0, 36], sizes = [3, 288], strides = [1, 1]} : vector<3x326xbf16> to vector<3x288xbf16>
    %cst_16 = arith.constant dense<0.000000e+00> : vector<16x288xf32>
    %40 = tpu.matmul %38, %39, %cst_16 {dimension_numbers = #tpu.dot_dimension_numbers<[1], [0], [0], [1], [0, 0, 1, 1], [], []>} : vector<16x3xbf16>, vector<3x288xbf16>, vector<16x288xf32> -> vector<16x288xf32>
    %41 = arith.addf %36, %40 : vector<16x288xf32>
    %42 = vector.extract_strided_slice %4 {offsets = [2, 1, 0, 0], sizes = [1, 1, 16, 3], strides = [1, 1, 1, 1]} : vector<3x3x16x3xbf16> to vector<1x1x16x3xbf16>
    %43 = vector.shape_cast %42 : vector<1x1x16x3xbf16> to vector<16x3xbf16>
    %44 = vector.extract_strided_slice %3 {offsets = [0, 37], sizes = [3, 288], strides = [1, 1]} : vector<3x326xbf16> to vector<3x288xbf16>
    %cst_17 = arith.constant dense<0.000000e+00> : vector<16x288xf32>
    %45 = tpu.matmul %43, %44, %cst_17 {dimension_numbers = #tpu.dot_dimension_numbers<[1], [0], [0], [1], [0, 0, 1, 1], [], []>} : vector<16x3xbf16>, vector<3x288xbf16>, vector<16x288xf32> -> vector<16x288xf32>
    %46 = arith.addf %41, %45 : vector<16x288xf32>
    %47 = vector.extract_strided_slice %4 {offsets = [2, 2, 0, 0], sizes = [1, 1, 16, 3], strides = [1, 1, 1, 1]} : vector<3x3x16x3xbf16> to vector<1x1x16x3xbf16>
    %48 = vector.shape_cast %47 : vector<1x1x16x3xbf16> to vector<16x3xbf16>
    %49 = vector.extract_strided_slice %3 {offsets = [0, 38], sizes = [3, 288], strides = [1, 1]} : vector<3x326xbf16> to vector<3x288xbf16>
    %cst_18 = arith.constant dense<0.000000e+00> : vector<16x288xf32>
    %50 = tpu.matmul %48, %49, %cst_18 {dimension_numbers = #tpu.dot_dimension_numbers<[1], [0], [0], [1], [0, 0, 1, 1], [], []>} : vector<16x3xbf16>, vector<3x288xbf16>, vector<16x288xf32> -> vector<16x288xf32>
    %51 = arith.addf %46, %50 : vector<16x288xf32>
    %52 = vector.broadcast %5 : vector<16x1xf32> to vector<16x288xf32>
    %53 = arith.addf %51, %52 : vector<16x288xf32>
    %cst_19 = arith.constant 0.000000e+00 : f32
    %54 = vector.broadcast %cst_19 : f32 to vector<16x288xf32>
    %55 = arith.maximumf %53, %54 : vector<16x288xf32>
    %56 = arith.truncf %55 : vector<16x288xf32> to vector<16x288xbf16>
    %57 = vector.broadcast %2 : vector<1x288xbf16> to vector<16x288xbf16>
    %58 = arith.mulf %56, %57 : vector<16x288xbf16>
    %cst_20 = arith.constant 0.000000e+00 : bf16
    %59 = vector.broadcast %cst_20 : bf16 to vector<16x19xbf16>
    %60 = tpu.concatenate %59, %58, %59 in 1 : vector<16x19xbf16>, vector<16x288xbf16>, vector<16x19xbf16> -> vector<16x326xbf16>
    %c0_21 = arith.constant 0 : index
    %c0_22 = arith.constant 0 : index
    %61 = vector.load %arg5[%c0_21, %c0_22] : memref<16x144xbf16, #tpu.memory_space<vmem>>, vector<16x144xbf16>
    %c0_23 = arith.constant 0 : index
    %c0_24 = arith.constant 0 : index
    %62 = vector.load %arg6[%c0_23, %c0_24] : memref<16x1xf32, #tpu.memory_space<vmem>>, vector<16x1xf32>
    %63 = vector.extract_strided_slice %60 {offsets = [0, 0], sizes = [16, 288], strides = [1, 1]} : vector<16x326xbf16> to vector<16x288xbf16>
    %64 = vector.extract_strided_slice %60 {offsets = [0, 1], sizes = [16, 288], strides = [1, 1]} : vector<16x326xbf16> to vector<16x288xbf16>
    %65 = vector.extract_strided_slice %60 {offsets = [0, 2], sizes = [16, 288], strides = [1, 1]} : vector<16x326xbf16> to vector<16x288xbf16>
    %66 = vector.extract_strided_slice %60 {offsets = [0, 18], sizes = [16, 288], strides = [1, 1]} : vector<16x326xbf16> to vector<16x288xbf16>
    %67 = vector.extract_strided_slice %60 {offsets = [0, 19], sizes = [16, 288], strides = [1, 1]} : vector<16x326xbf16> to vector<16x288xbf16>
    %68 = vector.extract_strided_slice %60 {offsets = [0, 20], sizes = [16, 288], strides = [1, 1]} : vector<16x326xbf16> to vector<16x288xbf16>
    %69 = vector.extract_strided_slice %60 {offsets = [0, 36], sizes = [16, 288], strides = [1, 1]} : vector<16x326xbf16> to vector<16x288xbf16>
    %70 = vector.extract_strided_slice %60 {offsets = [0, 37], sizes = [16, 288], strides = [1, 1]} : vector<16x326xbf16> to vector<16x288xbf16>
    %71 = vector.extract_strided_slice %60 {offsets = [0, 38], sizes = [16, 288], strides = [1, 1]} : vector<16x326xbf16> to vector<16x288xbf16>
    %72 = tpu.concatenate %63, %64, %65, %66, %67, %68, %69, %70, %71 in 0 : vector<16x288xbf16>, vector<16x288xbf16>, vector<16x288xbf16>, vector<16x288xbf16>, vector<16x288xbf16>, vector<16x288xbf16>, vector<16x288xbf16>, vector<16x288xbf16>, vector<16x288xbf16> -> vector<144x288xbf16>
    %cst_25 = arith.constant dense<0.000000e+00> : vector<16x288xf32>
    %73 = tpu.matmul %61, %72, %cst_25 {dimension_numbers = #tpu.dot_dimension_numbers<[1], [0], [0], [1], [0, 0, 1, 1], [], []>} : vector<16x144xbf16>, vector<144x288xbf16>, vector<16x288xf32> -> vector<16x288xf32>
    %74 = vector.broadcast %62 : vector<16x1xf32> to vector<16x288xf32>
    %75 = arith.addf %73, %74 : vector<16x288xf32>
    %cst_26 = arith.constant 0.000000e+00 : f32
    %76 = vector.broadcast %cst_26 : f32 to vector<16x288xf32>
    %77 = arith.maximumf %75, %76 : vector<16x288xf32>
    %78 = arith.truncf %77 : vector<16x288xf32> to vector<16x288xbf16>
    %79 = vector.broadcast %2 : vector<1x288xbf16> to vector<16x288xbf16>
    %80 = arith.mulf %78, %79 : vector<16x288xbf16>
    %cst_27 = arith.constant 0.000000e+00 : bf16
    %81 = vector.broadcast %cst_27 : bf16 to vector<16x19xbf16>
    %82 = tpu.concatenate %81, %80, %81 in 1 : vector<16x19xbf16>, vector<16x288xbf16>, vector<16x19xbf16> -> vector<16x326xbf16>
    %c0_28 = arith.constant 0 : index
    %c0_29 = arith.constant 0 : index
    %83 = vector.load %arg7[%c0_28, %c0_29] : memref<1x144xbf16, #tpu.memory_space<vmem>>, vector<1x144xbf16>
    %c0_30 = arith.constant 0 : index
    %c0_31 = arith.constant 0 : index
    %84 = vector.load %arg8[%c0_30, %c0_31] : memref<1x1xf32, #tpu.memory_space<vmem>>, vector<1x1xf32>
    %85 = vector.extract_strided_slice %82 {offsets = [0, 0], sizes = [16, 288], strides = [1, 1]} : vector<16x326xbf16> to vector<16x288xbf16>
    %86 = vector.extract_strided_slice %82 {offsets = [0, 1], sizes = [16, 288], strides = [1, 1]} : vector<16x326xbf16> to vector<16x288xbf16>
    %87 = vector.extract_strided_slice %82 {offsets = [0, 2], sizes = [16, 288], strides = [1, 1]} : vector<16x326xbf16> to vector<16x288xbf16>
    %88 = vector.extract_strided_slice %82 {offsets = [0, 18], sizes = [16, 288], strides = [1, 1]} : vector<16x326xbf16> to vector<16x288xbf16>
    %89 = vector.extract_strided_slice %82 {offsets = [0, 19], sizes = [16, 288], strides = [1, 1]} : vector<16x326xbf16> to vector<16x288xbf16>
    %90 = vector.extract_strided_slice %82 {offsets = [0, 20], sizes = [16, 288], strides = [1, 1]} : vector<16x326xbf16> to vector<16x288xbf16>
    %91 = vector.extract_strided_slice %82 {offsets = [0, 36], sizes = [16, 288], strides = [1, 1]} : vector<16x326xbf16> to vector<16x288xbf16>
    %92 = vector.extract_strided_slice %82 {offsets = [0, 37], sizes = [16, 288], strides = [1, 1]} : vector<16x326xbf16> to vector<16x288xbf16>
    %93 = vector.extract_strided_slice %82 {offsets = [0, 38], sizes = [16, 288], strides = [1, 1]} : vector<16x326xbf16> to vector<16x288xbf16>
    %94 = tpu.concatenate %85, %86, %87, %88, %89, %90, %91, %92, %93 in 0 : vector<16x288xbf16>, vector<16x288xbf16>, vector<16x288xbf16>, vector<16x288xbf16>, vector<16x288xbf16>, vector<16x288xbf16>, vector<16x288xbf16>, vector<16x288xbf16>, vector<16x288xbf16> -> vector<144x288xbf16>
    %cst_32 = arith.constant dense<0.000000e+00> : vector<1x288xf32>
    %95 = tpu.matmul %83, %94, %cst_32 {dimension_numbers = #tpu.dot_dimension_numbers<[1], [0], [0], [1], [0, 0, 1, 1], [], []>} : vector<1x144xbf16>, vector<144x288xbf16>, vector<1x288xf32> -> vector<1x288xf32>
    %96 = vector.broadcast %84 : vector<1x1xf32> to vector<1x288xf32>
    %97 = arith.addf %95, %96 : vector<1x288xf32>
    %98 = vector.extract_strided_slice %1 {offsets = [0, 19], sizes = [1, 288], strides = [1, 1]} : vector<3x326xf32> to vector<1x288xf32>
    %99 = arith.addf %97, %98 : vector<1x288xf32>
    %c0_33 = arith.constant 0 : index
    %c0_34 = arith.constant 0 : index
    %c0_35 = arith.constant 0 : index
    %100 = vector.load %arg9[%c0_33, %c0_34, %c0_35] : memref<1x1x288xf32, #tpu.memory_space<vmem>>, vector<1x1x288xf32>
    %101 = vector.shape_cast %100 : vector<1x1x288xf32> to vector<1x288xf32>
    %102 = vector.shape_cast %99 : vector<1x288xf32> to vector<1x1x288xf32>
    tpu.vector_store %arg9[%c0_33, %c0_34, %c0_35], %102 {strides = array<i32>} : memref<1x1x288xf32, #tpu.memory_space<vmem>>, vector<1x1x288xf32>,
    return
  }
  func.func @transform_0(%arg0: i32) -> (i32, i32, i32) {
    %c0_i32 = arith.constant 0 : i32
    %c0_i32_0 = arith.constant 0 : i32
    %c0_i32_1 = arith.constant 0 : i32
    return %arg0, %c0_i32, %c0_i32_0 : i32, i32, i32
  }
  func.func @transform_1(%arg0: i32) -> (i32, i32) {
    %c0_i32 = arith.constant 0 : i32
    %c0_i32_0 = arith.constant 0 : i32
    %c0_i32_1 = arith.constant 0 : i32
    return %c0_i32, %c0_i32_0 : i32, i32
  }
  func.func @transform_2(%arg0: i32) -> (i32, i32, i32, i32) {
    %c0_i32 = arith.constant 0 : i32
    %c0_i32_0 = arith.constant 0 : i32
    %c0_i32_1 = arith.constant 0 : i32
    %c0_i32_2 = arith.constant 0 : i32
    %c0_i32_3 = arith.constant 0 : i32
    return %c0_i32, %c0_i32_0, %c0_i32_1, %c0_i32_2 : i32, i32, i32, i32
  }
  func.func @transform_3(%arg0: i32) -> (i32, i32) {
    %c0_i32 = arith.constant 0 : i32
    %c0_i32_0 = arith.constant 0 : i32
    %c0_i32_1 = arith.constant 0 : i32
    return %c0_i32, %c0_i32_0 : i32, i32
  }
  func.func @transform_4(%arg0: i32) -> (i32, i32) {
    %c0_i32 = arith.constant 0 : i32
    %c0_i32_0 = arith.constant 0 : i32
    %c0_i32_1 = arith.constant 0 : i32
    return %c0_i32, %c0_i32_0 : i32, i32
  }
  func.func @transform_5(%arg0: i32) -> (i32, i32) {
    %c0_i32 = arith.constant 0 : i32
    %c0_i32_0 = arith.constant 0 : i32
    %c0_i32_1 = arith.constant 0 : i32
    return %c0_i32, %c0_i32_0 : i32, i32
  }
  func.func @transform_6(%arg0: i32) -> (i32, i32) {
    %c0_i32 = arith.constant 0 : i32
    %c0_i32_0 = arith.constant 0 : i32
    %c0_i32_1 = arith.constant 0 : i32
    return %c0_i32, %c0_i32_0 : i32, i32
  }
  func.func @transform_7(%arg0: i32) -> (i32, i32) {
    %c0_i32 = arith.constant 0 : i32
    %c0_i32_0 = arith.constant 0 : i32
    %c0_i32_1 = arith.constant 0 : i32
    return %c0_i32, %c0_i32_0 : i32, i32
  }
  func.func @transform_8(%arg0: i32) -> (i32, i32, i32) {
    %c0_i32 = arith.constant 0 : i32
    %c0_i32_0 = arith.constant 0 : i32
    %c0_i32_1 = arith.constant 0 : i32
    return %arg0, %c0_i32, %c0_i32_0 : i32, i32, i32
  }
}

</mosaic_0001>

<bundles_post_ra>
// kernel: tpu_custom_call.1
= control target key start
LH: loop header
LB: loop body
LE: loop exit
PB: predicated region body
PF: predicated region fallthrough
CT: control target
= control target key end

     0   :  { %s2878_s0 = inlined_call_operand.vmem [shape: f32[2,3,326], index: 0, kind: input, shape index: {}]   ;;  %s2879_s1 = inlined_call_operand.vmem [shape: bf16[1,288], index: 1, kind: input, shape index: {}]   ;;  %s2880_s2 = inlined_call_operand.vmem [shape: bf16[3,3,16,3], index: 2, kind: input, shape index: {}]   ;;  %s2881_s3 = inlined_call_operand.vmem [shape: f32[16,1], index: 3, kind: input, shape index: {}]   ;;  %s2882_s4 = inlined_call_operand.vmem [shape: bf16[16,144], index: 4, kind: input, shape index: {}]   ;;  %s2883_s5 = inlined_call_operand.vmem [shape: f32[16,1], index: 5, kind: input, shape index: {}]   ;;  %s2884_s6 = inlined_call_operand.vmem [shape: bf16[1,144], index: 6, kind: input, shape index: {}]   ;;  %s2885_s7 = inlined_call_operand.<no memory space> [shape: f32[1,1], index: 7, kind: input, shape index: {}]   ;;  %s2886_s8 = inlined_call_operand.hbm [shape: f32[2,1,288], index: 8, kind: output, shape index: {}]  }
   0x1   :  { %v13_v0 = vstv %s2885_s7 }
   0x2   :  { %14 = vst [vmem:[#allocation2] sm:$0x1] %v13_v0 }
   0x3   :  { %15 = vsyncpa [#allocation4], 0 }
   0x4   :  { %17 = vsyncpa [#allocation4 + $0x1], 0  ;;  %s2385_s29 = smov 0   ;;  %s2387_s30 = smov 0  }
   0x5   :  { %s2389_s9 = smov 0   ;;  %s2391_s10 = smov 0  }
   0x6 LB: > { %s2406_s7 = sadd.s32 4294967295, %s2320_s10   ;;  %s2036_s11 = sadd.s32 4294967294, %s2320_s10   ;;  %s2320_s10 = sphi %s2391_s10, %s2894_s10   ;;  %s2316_s9 = sphi %s2389_s9, %s2893_s9   ;;  %s2312_s30 = sphi %s2387_s30, %s2892_s30   ;;  %s2308_s29 = sphi %s2385_s29, %s2891_s29  }
   0x7   : > { %s2410_s12 = sadd.s32 1, %s2320_s10   ;;  %s203_s13 = sadd.s32 1, %s2316_s9 }
   0x8   : > { %s200_s14 = ssub.s32 %s2320_s10, %s2410_s12  ;;  %p213_p0 = scmp.ne.s32.totalorder %s2316_s9, %s2312_s30 }
   0x9   : > { %p201_p1 = scmp.eq.s32.totalorder %s200_s14, 0  ;;  %p214_p2 = scmp.eq.s32.totalorder %s2406_s7, 1 }
   0xa   : > { %p219_p3 = scmp.ne.s32.totalorder %s2312_s30, %s2308_s29  ;;  %p220_p4 = scmp.eq.s32.totalorder %s2036_s11, 1 }
   0xb   : > { %s2421_s15 = scalar_select %p201_p1, %s2316_s9, %s203_s13  }
   0xc   : > { %p2423_p5 = por %p214_p2, %p213_p0  ;;  %p2427_p6 = por %p220_p4, %p219_p3 }
   0xd   : > { %p2039_p7 = scmp.ge.s32.totalorder %s2320_s10, 1  ;;  %p267_p8 = scmp.lt.s32.totalorder %s2320_s10, 3 }
   0xf   : > { %p268_p9 = pnand %p2039_p7, %p267_p8 }
  0x10   : > { %p301_p10 = scmp.lt.s32.totalorder (!%p268_p9), %s2406_s7, 1  ;;  %v2322_v1 = vmov (!%p268_p9), 0.0   ;;  %vm2323_vm0 = vmmov (!%p268_p9), 0   ;;  %v2324_v6 = vmov (!%p268_p9), 0   ;;  %s2325_s23 = smov (!%p268_p9), 127   ;;  %v335_v9 = vld [vmem:[%s2881_s3] sm:$0xff] (!%p268_p9) }
  0x11   : > { %271 = sbr.rel (%p268_p9) target bundleno = 1509 (0x5e5), region = 52  ;;  %2101 = vmatprep.subr.bf16.mxu1 (!%p268_p9), %v2322_v1  ;;  %2103 = vmatprep.mubr.msk.bf16.mxu1 (!%p268_p9), %vm2323_vm0, %v2322_v1  ;;  %s2326_s24 = smov (!%p268_p9), 126   ;;  %v336_v10 = vld [vmem:[%s2881_s3 + $0x8] sm:$0xff] (!%p268_p9)  ;;  %vm358_vm1 = vcmask (!%p268_p9), 1040384   ;;  %vm351_vm2 = vcmask (!%p268_p9), 1039360   ;;  %vm359_vm3 = vcmask (!%p268_p9), 1041408  }
  0x12   : > { %403 = vmatprep.mubr.bf16.mxu0 (!%p268_p9), %v2324_v6  ;;  %2243 = vset.pattern.permute.xlu0 (!%p268_p9), %v2324_v6  ;;  %s2327_s25 = smov (!%p268_p9), 110   ;;  %s2328_s26 = smov (!%p268_p9), 109   ;;  %v2333_v13 = vmov (!%p268_p9), 65535   ;;  %v2246_v21 = vld [vmem:[%s2880_s2 + $0x8] sm:$0xff] (!%p268_p9)   ;;  %vm567_vm4 = vcmask (!%p268_p9), 1031168   ;;  %vm354_vm5 = vcmask (!%p268_p9), 23552  }
  0x13   : > { %2244 = vset.pattern.permute.xlu1 (!%p268_p9), %v2324_v6  ;;  %s2329_s27 = smov (!%p268_p9), 108   ;;  %s2330_s28 = smov (!%p268_p9), 92   ;;  %v360_v14 = vsel (!%p268_p9), %vm358_vm1, 4294967295, %v2333_v13  ;;  %v2247_v31 = vld [vmem:[%s2880_s2] sm:$0xff] (!%p268_p9)   ;;  %vm683_vm6 = vcmask (!%p268_p9), 900096   ;;  %v2248_v38 = vld [vmem:[%s2880_s2 + $0x10] sm:$0xff] (!%p268_p9)  }
  0x14   : > { %s2331_s11 = smov (!%p268_p9), 91   ;;  %s2332_s13 = smov (!%p268_p9), 90   ;;  %v2515_v17 = vsel (!%p268_p9), %vm359_vm3, %v360_v14, 0  ;;  %vm799_vm7 = vcmask (!%p268_p9), 891904   ;;  %v2249_v45 = vld [vmem:[%s2880_s2 + $0x18] sm:$0xff] (!%p268_p9)   ;;  %v2250_v53 = vld [vmem:[%s2880_s2 + $0x20] sm:$0xff] (!%p268_p9)  }
  0x15   : > { %vm915_vm8 = vcmask (!%p268_p9), 883712   ;;  %v2251_v62 = vld [vmem:[%s2880_s2 + $0x28] sm:$0xff] (!%p268_p9)   ;;  %vm1031_vm9 = vcmask (!%p268_p9), 752640   ;;  %vm1147_vm10 = vcmask (!%p268_p9), 744448   ;;  %vm1263_vm11 = vcmask (!%p268_p9), 736256   ;;  %s2335_s14 = smov (!%p268_p9), 19  }
  0x16   : > { %vm1450_vm12 = vcmask (!%p268_p9), 154624   ;;  %vm1459_vm13 = vcmask (!%p268_p9), 416768   ;;  %vm1576_vm15 = vcmask (!%p268_p9), 130048  }
  0x17   : > { %vm2675_vm14 = vmneg (!%p268_p9), %vm1450_vm12 }
  0x18   : > { %s302_s18 = scalar_select %p301_p10, %s2406_s7, 1 }
  0x1a   : > { %s2188_s19 = smul.u32 12, %s302_s18  ;;  %s2336_s18 = smov [#allocation3]  }
  0x1c   : > { %s305_s22 = scalar_lea.vmem %s2878_s0, %s2188_s19  ;;  %s2262_s19 = sshll.u32 %s2336_s18, 4  ;;  %s2263_s19 = int_to_ptr.vmem [resolvable:$false] %s2262_s19 }
  0x1d   : > { %v2439_v2 = vld [vmem:[%s305_s22] sm:$0x77]  ;;  %v2441_v3 = vld [vmem:[%s305_s22 + $0x8] sm:$0x7]  ;;  %s2264_s20 = scalar_lea.vmem %s2263_s19, 96 }
  0x1e   : > { %v2447_v4 = vpack.c.bf16 %v2439_v2, %v2439_v2  ;;  %v312_v5 = vcombine.high %v2439_v2, %v2439_v2  ;;  %v2462_v8 = vpack.c.bf16 %v2441_v3, %v2441_v3 }
  0x20   : > { %345 = vrot.lane.b32.xlu1 %v2447_v4, %s2325_s23  ;;  %v2455_v7 = vpack.c.bf16 %v312_v5, %v312_v5  ;;  %v470_v25 = vand.u32 %v2515_v17, %v2462_v8  ;;  %v464_v27 = vand.u32 %v2515_v17, %v2447_v4 }
  0x22   : > { %347 = vrot.lane.b32.xlu0 %v2455_v7, %s2325_s23  ;;  %v467_v22 = vand.u32 %v2515_v17, %v2455_v7 }
  0x24   : > { %563 = vrot.lane.b32.xlu1 %v2455_v7, %s2326_s24 }
  0x26   : > { %349 = vrot.lane.b32.xlu0 %v2462_v8, %s2325_s23 }
  0x28   : > { %561 = vrot.lane.b32.xlu1 %v2447_v4, %s2326_s24 }
  0x2a   : > { %565 = vrot.lane.b32.xlu0 %v2462_v8, %s2326_s24 }
  0x2c   : > { %681 = vrot.lane.b32.xlu1 %v2462_v8, %s2327_s25 }
  0x2e   : > { %679 = vrot.lane.b32.xlu0 %v2455_v7, %s2327_s25 }
  0x30   : > { %795 = vrot.lane.b32.xlu1 %v2455_v7, %s2328_s26 }
  0x32   : > { %677 = vrot.lane.b32.xlu0 %v2447_v4, %s2327_s25 }
  0x34   : > { %793 = vrot.lane.b32.xlu1 %v2447_v4, %s2328_s26 }
  0x36   : > { %797 = vrot.lane.b32.xlu0 %v2462_v8, %s2328_s26 }
  0x38   : > { %913 = vrot.lane.b32.xlu1 %v2462_v8, %s2329_s27 }
  0x3a   : > { %911 = vrot.lane.b32.xlu0 %v2455_v7, %s2329_s27 }
  0x3c   : > { %1027 = vrot.lane.b32.xlu1 %v2455_v7, %s2330_s28 }
  0x3e   : > { %909 = vrot.lane.b32.xlu0 %v2447_v4, %s2329_s27 }
  0x40   : > { %1025 = vrot.lane.b32.xlu1 %v2447_v4, %s2330_s28 }
  0x42   : > { %1029 = vrot.lane.b32.xlu0 %v2462_v8, %s2330_s28 }
  0x44   : > { %1145 = vrot.lane.b32.xlu1 %v2462_v8, %s2331_s11 }
  0x46   : > { %1143 = vrot.lane.b32.xlu0 %v2455_v7, %s2331_s11 }
  0x48   : > { %1259 = vrot.lane.b32.xlu1 %v2455_v7, %s2332_s13 }
  0x4a   : > { %1141 = vrot.lane.b32.xlu0 %v2447_v4, %s2331_s11 }
  0x4c   : > { %1257 = vrot.lane.b32.xlu1 %v2447_v4, %s2332_s13 }
  0x4e   : > { %1261 = vrot.lane.b32.xlu0 %v2462_v8, %s2332_s13  ;;  %v2252_v8 = vld [vmem:[%s2880_s2 + $0x30] sm:$0xff]  }
  0x50   : > { %1375 = vperm.xlu1 %2244, %v336_v10  }
  0x52   : > { %1370 = vperm.xlu0 %2243, %v335_v9  }
  0x92   : > { %v346_v12 = vpop.permute.xlu1 %345 }
  0x94   : > { %v348_v11 = vpop.permute.xlu0 %347 }
  0x95   : > { %v352_v15 = vsel %vm351_vm2, %v346_v12, %v348_v11 }
  0x96   : > { %v564_v23 = vpop.permute.xlu1 %563  ;;  %v363_v24 = vand.u32 %v2515_v17, %v352_v15  ;;  %v2253_v15 = vld [vmem:[%s2880_s2 + $0x38] sm:$0xff]  }
  0x98   : > { %v350_v16 = vpop.permute.xlu0 %349 }
  0x99   : > { %v369_v18 = vand.u32 %v2515_v17, %v350_v16  ;;  %v353_v19 = vsel %vm351_vm2, %v348_v11, %v350_v16 }
  0x9a   : > { %v366_v20 = vand.u32 %v2515_v17, %v353_v19  ;;  %v562_v30 = vpop.permute.xlu1 %561 }
  0x9b   : > { %2102 = vmatpush3.bf16.msra.mxu1 %v369_v18  ;;  %v568_v34 = vsel %vm567_vm4, %v562_v30, %v564_v23 }
  0x9c   : > { %371 = vmatprep.subr.bf16.mxu0 %v366_v20  ;;  %2107 = vmatprep.subr.bf16.mxu1 %v2322_v1  ;;  %v566_v26 = vpop.permute.xlu0 %565  ;;  %v574_v37 = vand.u32 %v568_v34, %v2515_v17 }
  0x9d   : > { %372 = vmatpush1.bf16.msra.mxu0 %v363_v24  ;;  %v569_v28 = vsel %vm567_vm4, %v564_v23, %v566_v26  ;;  %v580_v32 = vand.u32 %v566_v26, %v2515_v17 }
  0x9e   : > { %2104 = vmatmul.mubr.msk.bf16.vlgmr.msra.gmra.mrb[0].mxu1 %vm354_vm5, %v2246_v21  ;;  %472 = vmatprep.subr.bf16.mxu0 %v467_v22  ;;  %v577_v29 = vand.u32 %v569_v28, %v2515_v17  ;;  %v682_v35 = vpop.permute.xlu1 %681  ;;  %v2254_v22 = vld [vmem:[%s2880_s2 + $0x40] sm:$0xff]  }
  0x9f   : > { %2108 = vmatpush3.bf16.msra.mxu1 %v470_v25  ;;  %2109 = vmatprep.mubr.msk.bf16.mxu1 %vm2323_vm0, %v2322_v1  ;;  %v696_v41 = vand.u32 %v682_v35, %v2515_v17 }
  0xa0   : > { %2042 = vmatmul.mubr.msk.bf16.vlgmr.msra.gmra.mrb[0].mxu0 %vm354_vm5, %v2246_v21  ;;  %2113 = vmatprep.subr.bf16.mxu1 %v2322_v1  ;;  %v680_v33 = vpop.permute.xlu0 %679 }
  0xa1   : > { %473 = vmatpush1.bf16.msra.mxu0 %v464_v27  ;;  %504 = vmatprep.mubr.bf16.mxu0 %v2324_v6  ;;  %v685_v36 = vsel %vm683_vm6, %v680_v33, %v682_v35 }
  0xa2   : > { %582 = vmatprep.subr.bf16.mxu0 %v577_v29  ;;  %v693_v39 = vand.u32 %v685_v36, %v2515_v17  ;;  %v796_v42 = vpop.permute.xlu1 %795 }
  0xa4   : > { %v678_v40 = vpop.permute.xlu0 %677 }
  0xa5   : > { %v684_v44 = vsel %vm683_vm6, %v678_v40, %v680_v33 }
  0xa6   : > { %2110 = vmatmul.mubr.msk.bf16.vlgmr.msra.gmra.mrb[4].mxu1 %vm354_vm5, %v2247_v31  ;;  %v794_v46 = vpop.permute.xlu1 %793  ;;  %v690_v50 = vand.u32 %v684_v44, %v2515_v17 }
  0xa7   : > { %2114 = vmatpush3.bf16.msra.mxu1 %v580_v32  ;;  %2115 = vmatprep.mubr.msk.bf16.mxu1 %vm2323_vm0, %v2322_v1  ;;  %v800_v57 = vsel %vm799_vm7, %v794_v46, %v796_v42 }
  0xa8   : > { %2119 = vmatprep.subr.bf16.mxu1 %v2322_v1  ;;  %v798_v43 = vpop.permute.xlu0 %797  ;;  %v806_v60 = vand.u32 %v800_v57, %v2515_v17 }
  0xa9   : > { %v801_v47 = vsel %vm799_vm7, %v796_v42, %v798_v43  ;;  %v812_v48 = vand.u32 %v798_v43, %v2515_v17 }
  0xaa   : > { %v809_v51 = vand.u32 %v801_v47, %v2515_v17  ;;  %v914_v52 = vpop.permute.xlu1 %913 }
  0xab   : > { %v928_v55 = vand.u32 %v914_v52, %v2515_v17 }
  0xac   : > { %2045 = vmatmul.mubr.msk.bf16.vlgmr.msra.gmra.mrb[0].mxu0 %vm354_vm5, %v2247_v31  ;;  %v912_v49 = vpop.permute.xlu0 %911 }
  0xad   : > { %583 = vmatpush1.bf16.msra.mxu0 %v574_v37  ;;  %614 = vmatprep.mubr.bf16.mxu0 %v2324_v6  ;;  %v917_v58 = vsel %vm915_vm8, %v912_v49, %v914_v52 }
  0xae   : > { %2116 = vmatmul.mubr.msk.bf16.vlgmr.msra.gmra.mrb[8].mxu1 %vm354_vm5, %v2248_v38  ;;  %698 = vmatprep.subr.bf16.mxu0 %v693_v39  ;;  %v1028_v56 = vpop.permute.xlu1 %1027  ;;  %v925_v61 = vand.u32 %v917_v58, %v2515_v17 }
  0xaf   : > { %2120 = vmatpush3.bf16.msra.mxu1 %v696_v41  ;;  %2121 = vmatprep.mubr.msk.bf16.mxu1 %vm2323_vm0, %v2322_v1 }
  0xb0   : > { %2125 = vmatprep.subr.bf16.mxu1 %v2322_v1  ;;  %v910_v54 = vpop.permute.xlu0 %909 }
  0xb1   : > { %v916_v7 = vsel %vm915_vm8, %v910_v54, %v912_v49 }
  0xb2   : > { %v1026_v63 = vpop.permute.xlu1 %1025  ;;  %v922_v12 = vand.u32 %v916_v7, %v2515_v17 }
  0xb3   : > { %v1032_v18 = vsel %vm1031_vm9, %v1026_v63, %v1028_v56  ;;  %v2334_v63 = vmov 1966171168  }
  0xb4   : > { %v1030_v59 = vpop.permute.xlu0 %1029  ;;  %v1038_v20 = vand.u32 %v1032_v18, %v2515_v17 }
  0xb5   : > { %v1044_v0 = vand.u32 %v1030_v59, %v2515_v17  ;;  %v1033_v10 = vsel %vm1031_vm9, %v1028_v56, %v1030_v59 }
  0xb6   : > { %2122 = vmatmul.mubr.msk.bf16.vlgmr.msra.gmra.mrb[12].mxu1 %vm354_vm5, %v2249_v45  ;;  %v1146_v5 = vpop.permute.xlu1 %1145  ;;  %v1041_v13 = vand.u32 %v1033_v10, %v2515_v17 }
  0xb7   : > { %2126 = vmatpush3.bf16.msra.mxu1 %v812_v48  ;;  %2127 = vmatprep.mubr.msk.bf16.mxu1 %vm2323_vm0, %v2322_v1  ;;  %v1160_v11 = vand.u32 %v1146_v5, %v2515_v17 }
  0xb8   : > { %2048 = vmatmul.mubr.msk.bf16.vlgmr.msra.gmra.mrb[0].mxu0 %vm354_vm5, %v2248_v38  ;;  %2131 = vmatprep.subr.bf16.mxu1 %v2322_v1  ;;  %v1144_v4 = vpop.permute.xlu0 %1143 }
  0xb9   : > { %699 = vmatpush1.bf16.msra.mxu0 %v690_v50  ;;  %730 = vmatprep.mubr.bf16.mxu0 %v2324_v6  ;;  %v1149_v19 = vsel %vm1147_vm10, %v1144_v4, %v1146_v5 }
  0xba   : > { %814 = vmatprep.subr.bf16.mxu0 %v809_v51  ;;  %v1157_v21 = vand.u32 %v1149_v19, %v2515_v17  ;;  %v1260_v23 = vpop.permute.xlu1 %1259 }
  0xbc   : > { %v1142_v9 = vpop.permute.xlu0 %1141 }
  0xbe   : > { %2128 = vmatmul.mubr.msk.bf16.vlgmr.msra.gmra.mrb[16].mxu1 %vm354_vm5, %v2250_v53  ;;  %v1258_v27 = vpop.permute.xlu1 %1257 }
  0xbf   : > { %2132 = vmatpush3.bf16.msra.mxu1 %v928_v55  ;;  %2133 = vmatprep.mubr.msk.bf16.mxu1 %vm2323_vm0, %v2322_v1  ;;  %v1264_v28 = vsel %vm1263_vm11, %v1258_v27, %v1260_v23 }
  0xc0   : > { %2137 = vmatprep.subr.bf16.mxu1 %v2322_v1  ;;  %v1262_v14 = vpop.permute.xlu0 %1261  ;;  %v1270_v29 = vand.u32 %v1264_v28, %v2515_v17 }
  0xc1   : > { %v1276_v16 = vand.u32 %v1262_v14, %v2515_v17  ;;  %v1265_v24 = vsel %vm1263_vm11, %v1260_v23, %v1262_v14 }
  0xc2   : > { %v1273_v26 = vand.u32 %v1265_v24, %v2515_v17 }
  0xc4   : > { %2051 = vmatmul.mubr.msk.bf16.vlgmr.msra.gmra.mrb[0].mxu0 %vm354_vm5, %v2249_v45 }
  0xc5   : > { %815 = vmatpush1.bf16.msra.mxu0 %v806_v60  ;;  %846 = vmatprep.mubr.bf16.mxu0 %v2324_v6 }
  0xc6   : > { %2134 = vmatmul.mubr.msk.bf16.vlgmr.msra.gmra.mrb[20].mxu1 %vm354_vm5, %v2251_v62  ;;  %930 = vmatprep.subr.bf16.mxu0 %v925_v61 }
  0xc7   : > { %2138 = vmatpush3.bf16.msra.mxu1 %v1044_v0  ;;  %2139 = vmatprep.mubr.msk.bf16.mxu1 %vm2323_vm0, %v2322_v1  ;;  %v1403_v0 = vunpack.c.l.s4 %v2334_v63 }
  0xc8   : > { %2143 = vmatprep.subr.bf16.mxu1 %v2322_v1 }
  0xce   : > { %2140 = vmatmul.mubr.msk.bf16.vlgmr.msra.gmra.mrb[24].mxu1 %vm354_vm5, %v2252_v8 }
  0xcf   : > { %2144 = vmatpush3.bf16.msra.mxu1 %v1160_v11  ;;  %2145 = vmatprep.mubr.msk.bf16.mxu1 %vm2323_vm0, %v2322_v1 }
  0xd0   : > { %2054 = vmatmul.mubr.msk.bf16.vlgmr.msra.gmra.mrb[0].mxu0 %vm354_vm5, %v2250_v53  ;;  %2149 = vmatprep.subr.bf16.mxu1 %v2322_v1 }
  0xd1   : > { %931 = vmatpush1.bf16.msra.mxu0 %v922_v12  ;;  %962 = vmatprep.mubr.bf16.mxu0 %v2324_v6  ;;  %v1404_v12 = vunpack.c.0.s8 %v1403_v0 }
  0xd2   : > { %1046 = vmatprep.subr.bf16.mxu0 %v1041_v13 }
  0xd6   : > { %2146 = vmatmul.mubr.msk.bf16.vlgmr.msra.gmra.mrb[28].mxu1 %vm354_vm5, %v2253_v15 }
  0xd7   : > { %2150 = vmatpush3.bf16.msra.mxu1 %v1276_v16  ;;  %2151 = vmatprep.mubr.msk.bf16.mxu1 %vm2323_vm0, %v2322_v1  ;;  %v1148_v1 = vsel %vm1147_vm10, %v1142_v9, %v1144_v4  ;;  %v1405_v4 = vlaneseq  ;;  %v2068_v16 = vld.sshfl [vmem:[%s2879_s1] sm:$0x13 pattern:$0x75316420] }
  0xd8   : > { %1623 = vmatprep.subr.bf16.mxu1 %v2324_v6  ;;  %v1154_v25 = vand.u32 %v1148_v1, %v2515_v17 }
  0xd9   : > { %v2641_v13 = vshrl.u32 %v1405_v4, 7  ;;  %vm1959_vm0 = vcmp.lt.s32.totalorder %v1405_v4, 288 }
  0xdb   : > { %v2644_v14 = vsub.s32 %v1404_v12, %v2641_v13  ;;  %v1466_v12 = vld [vmem:[%s2883_s5 + $0x8] sm:$0xff] }
  0xdc   : > { %2057 = vmatmul.mubr.msk.bf16.vlgmr.msra.gmra.mrb[0].mxu0 %vm354_vm5, %v2251_v62 }
  0xdd   : > { %1047 = vmatpush1.bf16.msra.mxu0 %v1038_v20  ;;  %1078 = vmatprep.mubr.bf16.mxu0 %v2324_v6  ;;  %v1408_v1 = vrot.slane %v2068_v16, %v2644_v14 }
  0xde   : > { %2152 = vmatmul.mubr.msk.bf16.vlgmr.msra.gmra.mrb[32].mxu1 %vm354_vm5, %v2254_v22  ;;  %1162 = vmatprep.subr.bf16.mxu0 %v1157_v21 }
  0xdf   : > { %v1416_v23 = vcombine.high %v1408_v1, %v1408_v1 }
  0xe8   : > { %2060 = vmatmul.mubr.msk.bf16.vlgmr.msra.gmra.mrb[0].mxu0 %vm354_vm5, %v2252_v8 }
  0xe9   : > { %1163 = vmatpush1.bf16.msra.mxu0 %v1154_v25  ;;  %1194 = vmatprep.mubr.bf16.mxu0 %v2324_v6  ;;  %v1371_v25 = vpop.permute.xlu0 %1370 }
  0xea   : > { %1278 = vmatprep.subr.bf16.mxu0 %v1273_v26 }
  0xf4   : > { %2063 = vmatmul.mubr.msk.bf16.vlgmr.msra.gmra.mrb[0].mxu0 %vm354_vm5, %v2253_v15 }
  0xf5   : > { %1279 = vmatpush1.bf16.msra.mxu0 %v1270_v29  ;;  %1310 = vmatprep.mubr.bf16.mxu0 %v2324_v6  ;;  %v1376_v29 = vpop.permute.xlu1 %1375 }
 0x100   : > { %2066 = vmatmul.mubr.msk.bf16.vlgmr.msra.gmra.mrb[0].mxu0 %vm354_vm5, %v2254_v22 }
 0x171   : > { %v448_v30 = vpop.f32.mrb[0].mxu1 }
 0x172   : > { %v2105_v31 = vpop.f32.mrb[1].mxu1 }
 0x173   : > { %v451_v32 = vpop.f32.mrb[2].mxu1 }
 0x174   : > { %v2106_v33 = vpop.f32.mrb[3].mxu1 }
 0x175   : > { %v1432_v33 = vpack.i.b16 %v1416_v23, %v1416_v23 }
 0x179   : > { %v549_v34 = vpop.f32.mrb[4].mxu1 }
 0x17a   : > { %v550_v35 = vadd.f32 %v549_v34, %v448_v30  ;;  %v2111_v36 = vpop.f32.mrb[5].mxu1 }
 0x17b   : > { %v552_v37 = vpop.f32.mrb[6].mxu1 }
 0x17c   : > { %v553_v38 = vadd.f32 %v552_v37, %v451_v32  ;;  %v2112_v39 = vpop.f32.mrb[7].mxu1  ;;  %v2651_v32 = vsub.s32 0, %v2641_v13 }
 0x181   : > { %v659_v40 = vpop.f32.mrb[8].mxu1 }
 0x182   : > { %v668_v41 = vadd.f32 %v659_v40, %v550_v35  ;;  %v2117_v17 = vpop.f32.mrb[9].mxu1 }
 0x183   : > { %v662_v42 = vpop.f32.mrb[10].mxu1 }
 0x184   : > { %v671_v43 = vadd.f32 %v662_v42, %v553_v38  ;;  %v2118_v44 = vpop.f32.mrb[11].mxu1  ;;  %v2654_v38 = vrot.slane %v1432_v33, %v2651_v32 }
 0x189   : > { %v775_v45 = vpop.f32.mrb[12].mxu1 }
 0x18a   : > { %v784_v46 = vadd.f32 %v775_v45, %v668_v41  ;;  %v2123_v47 = vpop.f32.mrb[13].mxu1  ;;  %v1401_v41 = vcombine.high %v2068_v16, %v2068_v16 }
 0x18b   : > { %v778_v48 = vpop.f32.mrb[14].mxu1 }
 0x18c   : > { %v787_v49 = vadd.f32 %v778_v48, %v671_v43  ;;  %v2124_v50 = vpop.f32.mrb[15].mxu1  ;;  %v1415_v17 = vrot.slane %v1401_v41, %v2644_v14 }
 0x18e   : > { %v1425_v47 = vpack.i.b16 %v1415_v17, %v1415_v17 }
 0x191   : > { %v891_v51 = vpop.f32.mrb[16].mxu1 }
 0x192   : > { %v900_v52 = vadd.f32 %v891_v51, %v784_v46  ;;  %v2129_v53 = vpop.f32.mrb[17].mxu1 }
 0x193   : > { %v894_v54 = vpop.f32.mrb[18].mxu1 }
 0x194   : > { %v903_v55 = vadd.f32 %v894_v54, %v787_v49  ;;  %v2130_v56 = vpop.f32.mrb[19].mxu1 }
 0x195   : > { %v1418_v56 = vpack.i.b16 %v1408_v1, %v1408_v1 }
 0x199   : > { %v1007_v57 = vpop.f32.mrb[20].mxu1 }
 0x19a   : > { %v1016_v58 = vadd.f32 %v1007_v57, %v900_v52  ;;  %v2135_v59 = vpop.f32.mrb[21].mxu1 }
 0x19b   : > { %v1010_v60 = vpop.f32.mrb[22].mxu1 }
 0x19c   : > { %v1019_v61 = vadd.f32 %v1010_v60, %v903_v55  ;;  %v2136_v62 = vpop.f32.mrb[23].mxu1  ;;  %v2660_v55 = vrot.slane %v1425_v47, %v2651_v32  ;;  %v2664_v60 = vrot.slane %v1418_v56, %v2651_v32  ;;  %v2257_v56 = vld [vmem:[%s2882_s4] ss:$8 sps:$4 sm:$0xff]  }
 0x1a1   : > { %v1123_v5 = vpop.f32.mrb[24].mxu1 }
 0x1a2   : > { %v1132_v7 = vadd.f32 %v1123_v5, %v1016_v58  ;;  %v2141_v8 = vpop.f32.mrb[25].mxu1 }
 0x1a3   : > { %v1126_v9 = vpop.f32.mrb[26].mxu1 }
 0x1a4   : > { %v1135_v10 = vadd.f32 %v1126_v9, %v1019_v61  ;;  %v2142_v11 = vpop.f32.mrb[27].mxu1 }
 0x1a5   : > { %v2255_v11 = vld [vmem:[%s2882_s4 + $0x4] ss:$8 sps:$4 sm:$0xff]  }
 0x1a6   : > { %2074 = vmatprep.mubr.msk.bf16.mxu1 %vm1576_vm15, %v2255_v11  ;;  %2073 = vmatprep.mubr.msk.bf16.mxu0 %vm1576_vm15, %v2255_v11 }
 0x1a9   : > { %v1239_v15 = vpop.f32.mrb[28].mxu1 }
 0x1aa   : > { %v1248_v18 = vadd.f32 %v1239_v15, %v1132_v7  ;;  %v2147_v19 = vpop.f32.mrb[29].mxu1  ;;  %v1465_v15 = vld [vmem:[%s2883_s5] sm:$0xff] }
 0x1ab   : > { %v1242_v20 = vpop.f32.mrb[30].mxu1 }
 0x1ac   : > { %v1251_v21 = vadd.f32 %v1242_v20, %v1135_v10  ;;  %v2148_v22 = vpop.f32.mrb[31].mxu1 }
 0x1b1   : > { %v1355_v24 = vpop.f32.mrb[32].mxu1 }
 0x1b2   : > { %v1364_v26 = vadd.f32 %v1355_v24, %v1248_v18  ;;  %v2153_v27 = vpop.f32.mrb[33].mxu1 }
 0x1b3   : > { %v1358_v28 = vpop.f32.mrb[34].mxu1 }
 0x1b4   : > { %v1367_v30 = vadd.f32 %v1358_v28, %v1251_v21  ;;  %v1380_v31 = vadd.f32 %v1371_v25, %v1364_v26  ;;  %v2154_v34 = vpop.f32.mrb[35].mxu1 }
 0x1b6   : > { %v1383_v35 = vadd.f32 %v1376_v29, %v1367_v30  ;;  %v1386_v36 = vmax.f32 %v1380_v31, 0.0 }
 0x1b8   : > { %v1389_v37 = vmax.f32 %v1383_v35, 0.0 }
 0x1ba   : > { %v1392_v39 = vpack.c.bf16 %v1389_v37, %v1386_v36 }
 0x1bc   : > { %v1440_v40 = vmul.bf16 %v2654_v38, %v1392_v39 }
 0x1be   : > { %1448 = vrot.lane.b32.xlu0 %v1440_v40, %s2335_s14 }
 0x1d3   : > { %v1312_v42 = vpop.f32.mrb[0].mxu0 }
 0x1d4   : > { %v1378_v43 = vadd.f32 %v1371_v25, %v1312_v42  ;;  %v1314_v44 = vpop.f32.mrb[1].mxu0 }
 0x1d5   : > { %v1379_v45 = vadd.f32 %v1371_v25, %v1314_v44  ;;  %v1316_v46 = vpop.f32.mrb[2].mxu0 }
 0x1d6   : > { %v1381_v48 = vadd.f32 %v1376_v29, %v1316_v46  ;;  %v1318_v49 = vpop.f32.mrb[3].mxu0  ;;  %v1384_v51 = vmax.f32 %v1378_v43, 0.0 }
 0x1d7   : > { %v1382_v50 = vadd.f32 %v1376_v29, %v1318_v49  ;;  %v1385_v53 = vmax.f32 %v1379_v45, 0.0 }
 0x1d8   : > { %v1387_v52 = vmax.f32 %v1381_v48, 0.0 }
 0x1d9   : > { %v1388_v54 = vmax.f32 %v1382_v50, 0.0 }
 0x1da   : > { %v1390_v57 = vpack.c.bf16 %v1387_v52, %v1384_v51 }
 0x1db   : > { %v1391_v58 = vpack.c.bf16 %v1388_v54, %v1385_v53 }
 0x1dc   : > { %v1438_v61 = vmul.bf16 %v2664_v60, %v1390_v57 }
 0x1dd   : > { %v1439_v59 = vmul.bf16 %v2660_v55, %v1391_v58 }
 0x1df   : > { %1446 = vrot.lane.b32.xlu1 %v1439_v59, %s2335_s14 }
 0x1e3   : > { %1444 = vrot.lane.b32.xlu1 %v1438_v61, %s2335_s14 }
 0x230   : > { %v1449_v62 = vpop.permute.xlu0 %1448 }
 0x251   : > { %v1447_v63 = vpop.permute.xlu1 %1446 }
 0x252   : > { %v1452_v0 = vsel %vm1450_vm12, %v1447_v63, %v1449_v62 }
 0x253   : > { %v1461_v5 = vsel %vm1459_vm13, %v1452_v0, 0 }
 0x254   : > { %1624 = vmatpush1.bf16.msra.mxu1 %v1461_v5 }
 0x255   : > { %v1445_v7 = vpop.permute.xlu1 %1444  ;;  %1625 = vmatprep.subr.bf16.mxu1 %v2324_v6 }
 0x256   : > { %v1451_v8 = vsel %vm1450_vm12, %v1445_v7, %v1447_v63  ;;  %v1457_v9 = vsel %vm1450_vm12, 0, %v1445_v7 }
 0x257   : > { %1480 = vrot.lane.b32.xlu1 %v1457_v9, %s2326_s24  ;;  %1469 = vrot.lane.b32.xlu0 %v1457_v9, %s2325_s23 }
 0x258   : > { %1580 = vmatprep.subr.bf16.mxu0 %v1451_v8 }
 0x259   : > { %2072 = vmatpush1.bf16.msk.msra.mxu0 %vm2675_vm14, %v1445_v7 }
 0x25b   : > { %1491 = vrot.lane.b32.xlu0 %v1457_v9, %s2327_s25  ;;  %1482 = vrot.lane.b32.xlu1 %v1451_v8, %s2326_s24 }
 0x25f   : > { %1504 = vrot.lane.b32.xlu1 %v1451_v8, %s2328_s26  ;;  %1471 = vrot.lane.b32.xlu0 %v1451_v8, %s2325_s23 }
 0x263   : > { %1473 = vrot.lane.b32.xlu1 %v1461_v5, %s2325_s23  ;;  %1493 = vrot.lane.b32.xlu0 %v1451_v8, %s2327_s25 }
 0x267   : > { %1502 = vrot.lane.b32.xlu1 %v1457_v9, %s2328_s26  ;;  %1515 = vrot.lane.b32.xlu0 %v1451_v8, %s2329_s27 }
 0x26b   : > { %1495 = vrot.lane.b32.xlu1 %v1461_v5, %s2327_s25  ;;  %1484 = vrot.lane.b32.xlu0 %v1461_v5, %s2326_s24 }
 0x26f   : > { %1526 = vrot.lane.b32.xlu1 %v1451_v8, %s2330_s28  ;;  %1513 = vrot.lane.b32.xlu0 %v1457_v9, %s2329_s27 }
 0x273   : > { %1517 = vrot.lane.b32.xlu1 %v1461_v5, %s2329_s27  ;;  %1506 = vrot.lane.b32.xlu0 %v1461_v5, %s2328_s26 }
 0x277   : > { %1524 = vrot.lane.b32.xlu1 %v1457_v9, %s2330_s28  ;;  %1537 = vrot.lane.b32.xlu0 %v1451_v8, %s2331_s11 }
 0x27b   : > { %1539 = vrot.lane.b32.xlu1 %v1461_v5, %s2331_s11  ;;  %1528 = vrot.lane.b32.xlu0 %v1461_v5, %s2330_s28 }
 0x27f   : > { %1548 = vrot.lane.b32.xlu1 %v1451_v8, %s2332_s13  ;;  %1535 = vrot.lane.b32.xlu0 %v1457_v9, %s2331_s11 }
 0x283   : > { %1546 = vrot.lane.b32.xlu1 %v1457_v9, %s2332_s13  ;;  %1550 = vrot.lane.b32.xlu0 %v1461_v5, %s2332_s13 }
 0x287   : > { %1564 = vperm.xlu1 %2244, %v1466_v12   ;;  %1559 = vperm.xlu0 %2243, %v1465_v15  }
 0x2c9   : > { %v1481_v16 = vpop.permute.xlu1 %1480  ;;  %v1470_v18 = vpop.permute.xlu0 %1469 }
 0x2cd   : > { %v1492_v19 = vpop.permute.xlu0 %1491  ;;  %v1483_v20 = vpop.permute.xlu1 %1482 }
 0x2ce   : > { %v1486_v31 = vsel %vm567_vm4, %v1481_v16, %v1483_v20 }
 0x2d1   : > { %v1505_v21 = vpop.permute.xlu1 %1504  ;;  %v1472_v22 = vpop.permute.xlu0 %1471 }
 0x2d2   : > { %v1475_v25 = vsel %vm351_vm2, %v1470_v18, %v1472_v22 }
 0x2d5   : > { %v1474_v1 = vpop.permute.xlu1 %1473  ;;  %v1494_v23 = vpop.permute.xlu0 %1493 }
 0x2d6   : > { %1626 = vmatpush1.bf16.msra.mxu1 %v1474_v1  ;;  %v1476_v24 = vsel %vm351_vm2, %v1472_v22, %v1474_v1  ;;  %v1497_v36 = vsel %vm683_vm6, %v1492_v19, %v1494_v23 }
 0x2d7   : > { %1582 = vmatprep.subr.bf16.mxu0 %v1476_v24  ;;  %1627 = vmatprep.subr.bf16.mxu1 %v2324_v6 }
 0x2d8   : > { %1583 = vmatpush1.bf16.msra.mxu0 %v1475_v25 }
 0x2d9   : > { %v1503_v26 = vpop.permute.xlu1 %1502  ;;  %v1516_v27 = vpop.permute.xlu0 %1515 }
 0x2da   : > { %v1508_v41 = vsel %vm799_vm7, %v1503_v26, %v1505_v21 }
 0x2dd   : > { %v1496_v28 = vpop.permute.xlu1 %1495  ;;  %v1485_v29 = vpop.permute.xlu0 %1484 }
 0x2de   : > { %1628 = vmatpush1.bf16.msra.mxu1 %v1485_v29  ;;  %v1487_v30 = vsel %vm567_vm4, %v1483_v20, %v1485_v29  ;;  %v1498_v33 = vsel %vm683_vm6, %v1494_v23, %v1496_v28 }
 0x2df   : > { %1584 = vmatprep.subr.bf16.mxu0 %v1487_v30  ;;  %1629 = vmatprep.subr.bf16.mxu1 %v2324_v6 }
 0x2e0   : > { %1585 = vmatpush1.bf16.msra.mxu0 %v1486_v31 }
 0x2e1   : > { %v1527_v34 = vpop.permute.xlu1 %1526  ;;  %v1514_v35 = vpop.permute.xlu0 %1513  ;;  %1586 = vmatprep.subr.bf16.mxu0 %v1498_v33 }
 0x2e2   : > { %1630 = vmatpush1.bf16.msra.mxu1 %v1496_v28  ;;  %v1519_v44 = vsel %vm915_vm8, %v1514_v35, %v1516_v27 }
 0x2e3   : > { %1631 = vmatprep.subr.bf16.mxu1 %v2324_v6 }
 0x2e4   : > { %1587 = vmatpush1.bf16.msra.mxu0 %v1497_v36 }
 0x2e5   : > { %v1518_v37 = vpop.permute.xlu1 %1517  ;;  %v1507_v39 = vpop.permute.xlu0 %1506 }
 0x2e6   : > { %1632 = vmatpush1.bf16.msra.mxu1 %v1507_v39  ;;  %v1509_v40 = vsel %vm799_vm7, %v1505_v21, %v1507_v39  ;;  %v1520_v17 = vsel %vm915_vm8, %v1516_v27, %v1518_v37 }
 0x2e7   : > { %1588 = vmatprep.subr.bf16.mxu0 %v1509_v40  ;;  %1633 = vmatprep.subr.bf16.mxu1 %v2324_v6  ;;  %v1695_v40 = vld [vmem:[#allocation2] sm:$0x1] }
 0x2e8   : > { %1589 = vmatpush1.bf16.msra.mxu0 %v1508_v41  ;;  %v1906_v41 = vrot.slane %v2439_v2, %v2651_v32 }
 0x2e9   : > { %v1525_v42 = vpop.permute.xlu1 %1524  ;;  %v1538_v43 = vpop.permute.xlu0 %1537  ;;  %1590 = vmatprep.subr.bf16.mxu0 %v1520_v17  ;;  %v1909_v17 = vsub.s32 4, %v2641_v13 }
 0x2ea   : > { %1634 = vmatpush1.bf16.msra.mxu1 %v1518_v37  ;;  %v1530_v48 = vsel %vm1031_vm9, %v1525_v42, %v1527_v34 }
 0x2eb   : > { %1635 = vmatprep.subr.bf16.mxu1 %v2324_v6  ;;  %v1910_v42 = vrot.slane %v2439_v2, %v1909_v17 }
 0x2ec   : > { %1591 = vmatpush1.bf16.msra.mxu0 %v1519_v44 }
 0x2ed   : > { %v1540_v45 = vpop.permute.xlu1 %1539  ;;  %v1529_v46 = vpop.permute.xlu0 %1528 }
 0x2ee   : > { %1636 = vmatpush1.bf16.msra.mxu1 %v1529_v46  ;;  %v1531_v47 = vsel %vm1031_vm9, %v1527_v34, %v1529_v46  ;;  %v1542_v49 = vsel %vm1147_vm10, %v1538_v43, %v1540_v45 }
 0x2ef   : > { %1592 = vmatprep.subr.bf16.mxu0 %v1531_v47  ;;  %1637 = vmatprep.subr.bf16.mxu1 %v2324_v6 }
 0x2f0   : > { %1593 = vmatpush1.bf16.msra.mxu0 %v1530_v48 }
 0x2f1   : > { %v1549_v50 = vpop.permute.xlu1 %1548  ;;  %v1536_v51 = vpop.permute.xlu0 %1535  ;;  %1594 = vmatprep.subr.bf16.mxu0 %v1542_v49 }
 0x2f2   : > { %v1541_v52 = vsel %vm1147_vm10, %v1536_v51, %v1538_v43  ;;  %1638 = vmatpush1.bf16.msra.mxu1 %v1540_v45  ;;  %v1914_v43 = vrot.slane %v2441_v3, %v2651_v32 }
 0x2f3   : > { %1639 = vmatprep.subr.bf16.mxu1 %v2324_v6 }
 0x2f4   : > { %1595 = vmatpush1.bf16.msra.mxu0 %v1541_v52 }
 0x2f5   : > { %v1547_v53 = vpop.permute.xlu1 %1546  ;;  %v1551_v54 = vpop.permute.xlu0 %1550 }
 0x2f6   : > { %v1552_v57 = vsel %vm1263_vm11, %v1547_v53, %v1549_v50  ;;  %1640 = vmatpush1.bf16.msra.mxu1 %v1551_v54  ;;  %v1553_v58 = vsel %vm1263_vm11, %v1549_v50, %v1551_v54 }
 0x2f7   : > { %1596 = vmatprep.subr.bf16.mxu0 %v1553_v58  ;;  %1863 = vmatprep.subr.bf16.mxu1 %v2324_v6 }
 0x2f8   : > { %1597 = vmatpush1.bf16.msra.mxu0 %v1552_v57 }
 0x2f9   : > { %1656 = vmatmul.mubr.bf16.vlgmr.msra.gmra.mrb[36].mxu1 %v2257_v56 }
 0x2fb   : > { %1613 = vmatmul.mubr.bf16.vlgmr.msra.gmra.mrb[4].mxu0 %v2257_v56 }
 0x306   : > { %v1560_v59 = vpop.permute.xlu0 %1559  ;;  %v1565_v62 = vpop.permute.xlu1 %1564 }
 0x3cc   : > { %v1657_v61 = vpop.f32.mrb[36].mxu1 }
 0x3cd   : > { %v1658_v63 = vadd.f32 %v1657_v61, %v1560_v59  ;;  %v1659_v0 = vpop.f32.mrb[37].mxu1 }
 0x3ce   : > { %v1614_v5 = vpop.f32.mrb[4].mxu0  ;;  %v1660_v7 = vpop.f32.mrb[38].mxu1 }
 0x3cf   : > { %v1615_v8 = vadd.f32 %v1614_v5, %v1560_v59  ;;  %v1661_v9 = vadd.f32 %v1660_v7, %v1565_v62  ;;  %v1616_v11 = vpop.f32.mrb[5].mxu0  ;;  %v1662_v12 = vpop.f32.mrb[39].mxu1  ;;  %v1666_v18 = vmax.f32 %v1658_v63, 0.0 }
 0x3d0   : > { %v1617_v15 = vadd.f32 %v1616_v11, %v1560_v59  ;;  %v1618_v16 = vpop.f32.mrb[6].mxu0 }
 0x3d1   : > { %v1669_v19 = vmax.f32 %v1661_v9, 0.0  ;;  %v1619_v20 = vadd.f32 %v1618_v16, %v1565_v62  ;;  %v1620_v21 = vpop.f32.mrb[7].mxu0  ;;  %v1664_v1 = vmax.f32 %v1615_v8, 0.0 }
 0x3d2   : > { %v1621_v22 = vadd.f32 %v1620_v21, %v1565_v62  ;;  %v1665_v25 = vmax.f32 %v1617_v15, 0.0 }
 0x3d3   : > { %v1672_v23 = vpack.c.bf16 %v1669_v19, %v1666_v18  ;;  %v1667_v24 = vmax.f32 %v1619_v20, 0.0 }
 0x3d4   : > { %v1668_v26 = vmax.f32 %v1621_v22, 0.0 }
 0x3d5   : > { %v1670_v27 = vpack.c.bf16 %v1667_v24, %v1664_v1  ;;  %v1675_v28 = vmul.bf16 %v1672_v23, %v2654_v38 }
 0x3d6   : > { %v1671_v29 = vpack.c.bf16 %v1668_v26, %v1665_v25 }
 0x3d7   : > { %1683 = vrot.lane.b32.xlu1 %v1675_v28, %s2335_s14  ;;  %v1673_v31 = vmul.bf16 %v1670_v27, %v2664_v60  ;;  %v2775_v60 = vld.sshfl [vmem:[%s2884_s6] sm:$0x11 pattern:$0x75316420] }
 0x3d8   : > { %v1674_v30 = vmul.bf16 %v1671_v29, %v2660_v55  ;;  %v1803_v10 = vcombine.high %v2775_v60, %v2775_v60  ;;  %v1810_v25 = vrot.slane %v2775_v60, %v2644_v14 }
 0x3da   : > { %1681 = vrot.lane.b32.xlu0 %v1674_v30, %s2335_s14  ;;  %v1817_v39 = vrot.slane %v1803_v10, %v2644_v14 }
 0x3dc   : > { %2079 = vmatprep.mubr.msk.bf16.mxu1 %vm1576_vm15, %v1817_v39  ;;  %2078 = vmatprep.mubr.msk.bf16.mxu0 %vm1576_vm15, %v1817_v39 }
 0x3de   : > { %1679 = vrot.lane.b32.xlu0 %v1673_v31, %s2335_s14 }
 0x449   : > { %v1684_v33 = vpop.permute.xlu1 %1683 }
 0x44c   : > { %v1682_v34 = vpop.permute.xlu0 %1681 }
 0x44d   : > { %v1686_v35 = vsel %vm1450_vm12, %v1682_v34, %v1684_v33 }
 0x44e   : > { %v1692_v36 = vsel %vm1459_vm13, %v1686_v35, 0 }
 0x44f   : > { %1864 = vmatpush1.bf16.msra.mxu1 %v1692_v36 }
 0x450   : > { %v1680_v37 = vpop.permute.xlu0 %1679  ;;  %1865 = vmatprep.subr.bf16.mxu1 %v2324_v6 }
 0x451   : > { %v1685_v38 = vsel %vm1450_vm12, %v1680_v37, %v1682_v34  ;;  %v1689_v55 = vsel %vm1450_vm12, 0, %v1680_v37 }
 0x452   : > { %1709 = vrot.lane.b32.xlu0 %v1689_v55, %s2326_s24  ;;  %1698 = vrot.lane.b32.xlu1 %v1689_v55, %s2325_s23 }
 0x453   : > { %1822 = vmatprep.subr.bf16.mxu0 %v1685_v38 }
 0x454   : > { %2077 = vmatpush1.bf16.msk.msra.mxu0 %vm2675_vm14, %v1680_v37 }
 0x456   : > { %1720 = vrot.lane.b32.xlu1 %v1689_v55, %s2327_s25  ;;  %1711 = vrot.lane.b32.xlu0 %v1685_v38, %s2326_s24 }
 0x45a   : > { %1733 = vrot.lane.b32.xlu0 %v1685_v38, %s2328_s26  ;;  %1700 = vrot.lane.b32.xlu1 %v1685_v38, %s2325_s23 }
 0x45e   : > { %1702 = vrot.lane.b32.xlu0 %v1692_v36, %s2325_s23  ;;  %1722 = vrot.lane.b32.xlu1 %v1685_v38, %s2327_s25 }
 0x462   : > { %1731 = vrot.lane.b32.xlu0 %v1689_v55, %s2328_s26  ;;  %1744 = vrot.lane.b32.xlu1 %v1685_v38, %s2329_s27 }
 0x466   : > { %1724 = vrot.lane.b32.xlu0 %v1692_v36, %s2327_s25  ;;  %1713 = vrot.lane.b32.xlu1 %v1692_v36, %s2326_s24  ;;  %s298_s24 = sand.u32 1, %s2312_s30  }
 0x467   : > { %s2187_s25 = smul.u32 3, %s298_s24  ;;  %s1963_s22 = scalar_lea.sflag [#allocation4], %s298_s24 }
 0x46a   : > { %1755 = vrot.lane.b32.xlu0 %v1685_v38, %s2330_s28  ;;  %1742 = vrot.lane.b32.xlu1 %v1689_v55, %s2329_s27 }
 0x46e   : > { %1746 = vrot.lane.b32.xlu0 %v1692_v36, %s2329_s27  ;;  %1735 = vrot.lane.b32.xlu1 %v1692_v36, %s2328_s26  ;;  %s300_s27 = scalar_lea.vmem [#allocation3], %s2187_s25 }
 0x472   : > { %1753 = vrot.lane.b32.xlu0 %v1689_v55, %s2330_s28  ;;  %1766 = vrot.lane.b32.xlu1 %v1685_v38, %s2331_s11 }
 0x476   : > { %1768 = vrot.lane.b32.xlu0 %v1692_v36, %s2331_s11  ;;  %1757 = vrot.lane.b32.xlu1 %v1692_v36, %s2330_s28  ;;  %s1977_s28 = sshll.u32 %s300_s27, 4  ;;  %s2838_s28 = int_to_ptr.vmem [resolvable:$true] %s1977_s28 }
 0x477   : > { %p2265_p0 = scmp.lt.s32.totalorder %s2838_s28, %s2263_s19 }
 0x47a   : > { %1777 = vrot.lane.b32.xlu0 %v1685_v38, %s2332_s13  ;;  %1764 = vrot.lane.b32.xlu1 %v1689_v55, %s2331_s11 }
 0x47e   : > { %1775 = vrot.lane.b32.xlu0 %v1689_v55, %s2332_s13  ;;  %1779 = vrot.lane.b32.xlu1 %v1692_v36, %s2332_s13 }
 0x482   : > { %1788 = vperm.xlu1 %2244, %v1695_v40   ;;  %1915 = vrot.lane.b32.xlu0 %v1906_v41, %s2328_s26 }
 0x486   : > { %1917 = vrot.lane.b32.xlu1 %v1910_v42, %s2328_s26  ;;  %1919 = vrot.lane.b32.xlu0 %v1914_v43, %s2328_s26  ;;  %s2189_s26 = smul.u32 48, %s2406_s7  ;;  %s2258_s7 = scalar_lea.vmem %s2838_s28, 48 }
 0x487   : > { %p2259_p11 = scmp.ne.s32.totalorder %s2838_s28, %s2258_s7  ;;  %p2266_p1 = scmp.lt.s32.totalorder %s2264_s20, %s2258_s7 }
 0x488   : > { %s2836_s21 = scalar_lea.hbm %s2886_s8, %s2189_s26 }
 0x489   : > { %p2260_p12 = pnand %p2259_p11, %p2423_p5  ;;  %p2267_p2 = por %p2266_p1, %p2265_p0 }
 0x48b   : > { %p2261_p13 = pneg %p2260_p12 }
 0x48d   : > { %p2268_p3 = pnand %p2267_p2, %p2261_p13 }
 0x4c4   : > { %v1710_v44 = vpop.permute.xlu0 %1709  ;;  %v1699_v45 = vpop.permute.xlu1 %1698 }
 0x4c8   : > { %v1721_v46 = vpop.permute.xlu1 %1720  ;;  %v1712_v47 = vpop.permute.xlu0 %1711 }
 0x4c9   : > { %v1715_v57 = vsel %vm567_vm4, %v1710_v44, %v1712_v47 }
 0x4cc   : > { %v1734_v48 = vpop.permute.xlu0 %1733  ;;  %v1701_v49 = vpop.permute.xlu1 %1700 }
 0x4cd   : > { %v1704_v2 = vsel %vm351_vm2, %v1699_v45, %v1701_v49 }
 0x4d0   : > { %v1703_v50 = vpop.permute.xlu0 %1702  ;;  %v1723_v51 = vpop.permute.xlu1 %1722 }
 0x4d1   : > { %1866 = vmatpush1.bf16.msra.mxu1 %v1703_v50  ;;  %v1705_v13 = vsel %vm351_vm2, %v1701_v49, %v1703_v50  ;;  %v1726_v62 = vsel %vm683_vm6, %v1721_v46, %v1723_v51 }
 0x4d2   : > { %1824 = vmatprep.subr.bf16.mxu0 %v1705_v13  ;;  %1867 = vmatprep.subr.bf16.mxu1 %v2324_v6 }
 0x4d3   : > { %1825 = vmatpush1.bf16.msra.mxu0 %v1704_v2 }
 0x4d4   : > { %v1732_v3 = vpop.permute.xlu0 %1731  ;;  %v1745_v52 = vpop.permute.xlu1 %1744 }
 0x4d5   : > { %v1737_v7 = vsel %vm799_vm7, %v1732_v3, %v1734_v48 }
 0x4d8   : > { %v1725_v53 = vpop.permute.xlu0 %1724  ;;  %v1714_v54 = vpop.permute.xlu1 %1713 }
 0x4d9   : > { %1868 = vmatpush1.bf16.msra.mxu1 %v1714_v54  ;;  %v1716_v56 = vsel %vm567_vm4, %v1712_v47, %v1714_v54  ;;  %v1727_v58 = vsel %vm683_vm6, %v1723_v51, %v1725_v53 }
 0x4da   : > { %1826 = vmatprep.subr.bf16.mxu0 %v1716_v56  ;;  %1869 = vmatprep.subr.bf16.mxu1 %v2324_v6 }
 0x4db   : > { %1827 = vmatpush1.bf16.msra.mxu0 %v1715_v57 }
 0x4dc   : > { %v1756_v59 = vpop.permute.xlu0 %1755  ;;  %v1743_v61 = vpop.permute.xlu1 %1742  ;;  %1828 = vmatprep.subr.bf16.mxu0 %v1727_v58 }
 0x4dd   : > { %1870 = vmatpush1.bf16.msra.mxu1 %v1725_v53  ;;  %v1748_v12 = vsel %vm915_vm8, %v1743_v61, %v1745_v52 }
 0x4de   : > { %1871 = vmatprep.subr.bf16.mxu1 %v2324_v6 }
 0x4df   : > { %1829 = vmatpush1.bf16.msra.mxu0 %v1726_v62 }
 0x4e0   : > { %v1747_v63 = vpop.permute.xlu0 %1746  ;;  %v1736_v0 = vpop.permute.xlu1 %1735 }
 0x4e1   : > { %1872 = vmatpush1.bf16.msra.mxu1 %v1736_v0  ;;  %v1738_v5 = vsel %vm799_vm7, %v1734_v48, %v1736_v0  ;;  %v1749_v8 = vsel %vm915_vm8, %v1745_v52, %v1747_v63 }
 0x4e2   : > { %1830 = vmatprep.subr.bf16.mxu0 %v1738_v5  ;;  %1873 = vmatprep.subr.bf16.mxu1 %v2324_v6 }
 0x4e3   : > { %1831 = vmatpush1.bf16.msra.mxu0 %v1737_v7 }
 0x4e4   : > { %v1754_v9 = vpop.permute.xlu0 %1753  ;;  %v1767_v11 = vpop.permute.xlu1 %1766  ;;  %1832 = vmatprep.subr.bf16.mxu0 %v1749_v8 }
 0x4e5   : > { %1874 = vmatpush1.bf16.msra.mxu1 %v1747_v63  ;;  %v1759_v19 = vsel %vm1031_vm9, %v1754_v9, %v1756_v59 }
 0x4e6   : > { %1875 = vmatprep.subr.bf16.mxu1 %v2324_v6 }
 0x4e7   : > { %1833 = vmatpush1.bf16.msra.mxu0 %v1748_v12 }
 0x4e8   : > { %v1769_v15 = vpop.permute.xlu0 %1768  ;;  %v1758_v16 = vpop.permute.xlu1 %1757 }
 0x4e9   : > { %1876 = vmatpush1.bf16.msra.mxu1 %v1758_v16  ;;  %v1760_v18 = vsel %vm1031_vm9, %v1756_v59, %v1758_v16  ;;  %v1771_v20 = vsel %vm1147_vm10, %v1767_v11, %v1769_v15 }
 0x4ea   : > { %1834 = vmatprep.subr.bf16.mxu0 %v1760_v18  ;;  %1877 = vmatprep.subr.bf16.mxu1 %v2324_v6 }
 0x4eb   : > { %1835 = vmatpush1.bf16.msra.mxu0 %v1759_v19 }
 0x4ec   : > { %v1778_v21 = vpop.permute.xlu0 %1777  ;;  %v1765_v22 = vpop.permute.xlu1 %1764  ;;  %1836 = vmatprep.subr.bf16.mxu0 %v1771_v20 }
 0x4ed   : > { %v1770_v1 = vsel %vm1147_vm10, %v1765_v22, %v1767_v11  ;;  %1878 = vmatpush1.bf16.msra.mxu1 %v1769_v15 }
 0x4ee   : > { %1879 = vmatprep.subr.bf16.mxu1 %v2324_v6 }
 0x4ef   : > { %1837 = vmatpush1.bf16.msra.mxu0 %v1770_v1 }
 0x4f0   : > { %v1776_v23 = vpop.permute.xlu0 %1775  ;;  %v1780_v24 = vpop.permute.xlu1 %1779 }
 0x4f1   : > { %v1781_v26 = vsel %vm1263_vm11, %v1776_v23, %v1778_v21  ;;  %1880 = vmatpush1.bf16.msra.mxu1 %v1780_v24  ;;  %v1782_v27 = vsel %vm1263_vm11, %v1778_v21, %v1780_v24 }
 0x4f2   : > { %1838 = vmatprep.subr.bf16.mxu0 %v1782_v27 }
 0x4f3   : > { %1839 = vmatpush1.bf16.msra.mxu0 %v1781_v26 }
 0x4f4   : > { %1896 = vmatmul.mubr.bf16.vlgmr.msra.gmra.mrb[40].mxu1 %v1810_v25  ;;  %v1916_v28 = vpop.permute.xlu0 %1915 }
 0x4f6   : > { %1855 = vmatmul.mubr.bf16.vlgmr.msra.gmra.mrb[8].mxu0 %v1810_v25 }
 0x4f8   : > { %v1920_v33 = vpop.permute.xlu0 %1919 }
 0x501   : > { %v1789_v29 = vpop.permute.xlu1 %1788 }
 0x502   : > { %v1794_v6 = vrot.slane %v1789_v29, %v2651_v32 }
 0x505   : > { %v1918_v31 = vpop.permute.xlu1 %1917 }
 0x506   : > { %v1923_v38 = vsel %vm799_vm7, %v1918_v31, %v1920_v33  ;;  %v1922_v39 = vsel %vm799_vm7, %v1916_v28, %v1918_v31 }
 0x5c7   : > { %v1897_v30 = vpop.f32.mrb[40].mxu1 }
 0x5c8   : > { %v1899_v34 = vpop.f32.mrb[41].mxu1  ;;  %v1898_v35 = vadd.f32 %v1897_v30, %v1794_v6 }
 0x5c9   : > { %v1856_v36 = vpop.f32.mrb[8].mxu0  ;;  %v1900_v37 = vpop.f32.mrb[42].mxu1 }
 0x5ca   : > { %v1857_v55 = vadd.f32 %v1856_v36, %v1794_v6  ;;  %v1858_v60 = vpop.f32.mrb[9].mxu0  ;;  %v1901_v10 = vpop.f32.mrb[43].mxu1  ;;  %v1929_v42 = vadd.f32 %v1920_v33, %v1898_v35 }
 0x5cb   : > { %v1859_v40 = vadd.f32 %v1858_v60, %v1794_v6  ;;  %v1860_v41 = vpop.f32.mrb[10].mxu0 }
 0x5cc   : > { %v1927_v32 = vadd.f32 %v1922_v39, %v1857_v55  ;;  %v1861_v17 = vpop.f32.mrb[11].mxu0  ;;  %v1947_v45 = vrot.slane %v1929_v42, %v2644_v14 }
 0x5cd   : > { %v1928_v43 = vadd.f32 %v1923_v38, %v1859_v40 }
 0x5cf   : > { %v1933_v44 = vcombine.low %v1927_v32, %v1928_v43 }
 0x5d1   : > { %v1940_v46 = vrot.slane %v1933_v44, %v2644_v14 }
 0x5d3   : > { %v1948_v47 = vcombine.low %v1940_v46, %v1947_v45 }
 0x5d5   : > { %v1955_v48 = vrot.slane %v1948_v47, %v2644_v14 }
 0x5d7   : > { %1961 = vst.msk [vmem:[%s300_s27] sm:$0x7] %vm1959_vm0, %v1955_v48 }
 0x5d8   : > { %2271 = shalt.err (!%p2268_p3)
}
 0x5d9   : > { %s2272_s14 = scalar_lea.hbm %s2836_s21, 48  ;;  %s2276_s25 = scalar_lea.hbm %s2886_s8, 96 }
 0x5da   : > { %p2273_p4 = scmp.ne.s32.totalorder %s2836_s21, %s2272_s14  ;;  %p2277_p9 = scmp.lt.u32.totalorder %s2836_s21, %s2886_s8 }
 0x5db   : > { %p2278_p10 = scmp.lt.u32.totalorder %s2276_s25, %s2272_s14  ;;  %p2280_p12 = scmp.lt.u32.totalorder %s2272_s14, %s2836_s21 }
 0x5dc   : > { %p2274_p7 = pnand %p2273_p4, %p2423_p5 }
 0x5dd   : > { %p2279_p11 = por %p2278_p10, %p2277_p9 }
 0x5de   : > { %p2275_p8 = pneg %p2274_p7 }
 0x5df   : > { %p2281_p13 = por %p2280_p12, %p2279_p11 }
 0x5e1   : > { %p2282_p0 = pnand %p2281_p13, %p2275_p8 }
 0x5e3   : > { %2285 = shalt.err (!%p2282_p0)
}
 0x5e4   : > { %2190 = dma.vmem_to_hbm [thread:$0]  (%p2423_p5), %s2838_s28, 48, %s2836_s21, %s1963_s22  }
 0x5e5 PF: > { %p2196_p1 = scmp.ge.s32.totalorder %s2320_s10, 2  ;;  %s1989_s11 = sand.u32 1, %s2308_s29  }
 0x5e6   : > { %s1990_s13 = scalar_lea.sflag [#allocation4], %s1989_s11 }
 0x5e7   : > { %p2193_p2 = pnand %p2196_p1, %p2427_p6 }
 0x5e9   : > { %2303 = dma.done.wait (!%p2193_p2), %s1990_s13, 48  }
 0x5ea   : > { %2305 = vsyncadd (!%p2193_p2), %s1990_s13, 4294967248  ;;  %p20_p3 = scmp.ge.s32.totalorder %s2410_s12, 4   ;;  %s2891_s29 = smov %s2312_s30 }
 0x5eb   : > { %s2892_s30 = smov %s2316_s9  ;;  %s2893_s9 = smov %s2421_s15 }
 0x5ec   : > { %s2894_s10 = smov %s2410_s12  ;;  %22 = sbr.rel (!%p20_p3) target bundleno = 6 (0x6), region = 87 }
 0x5f3   :  { %1995 = vsyncpa [#allocation4], 1 }
 0x5f4   :  { %1997 = vsyncpa [#allocation4 + $0x1], 1 }

</bundles_post_ra>
